<compile_context>
chip_gen: v7x
topology: tpu7x:2x2x1
jax: 0.10.0
libtpu: 0.0.40
codegen_flags: <defaults>
</compile_context>

<pallas_src>
import jax
import jax.numpy as jnp
from jax.experimental import pallas as pl
from jax.experimental.pallas import tpu as pltpu


# --------------------------------------------------------------------------
# Kernel: one batch tile (TB samples) per grid step, everything VMEM-resident.
# --------------------------------------------------------------------------
def _spatial_regressor3_kernel(
    u_ref,      # (TB, N, F)   node features
    mask_ref,   # (TB, N)      1 = valid node, 0 = masked (lane-dense)
    w1_ref,     # (F, 2H)      [linear1_before | linear1_attn], BN folded
    b1_ref,     # (1, 2H)
    w2_ref,     # (2H, 2H)     block-diag [linear12_before | linear12_attn], BN folded
    b2_ref,     # (1, 2H)
    w3_ref,     # (2H, 2H)     block-diag [linear2_before | linear2_attn], BN folded
    b3_ref,     # (1, 2H)
    wa_ref,     # (3, H, H)    after-aggregation layers (1/12/2), BN folded
    ba_ref,     # (3, H)
    wr_ref,     # (1, H)       regression head row (bn3_after folded in)
    br_ref,     # (1, 1)       regression bias (bn3 shift folded in)
    out_ref,    # (TB, 1)
):
    TB, N, F = u_ref.shape
    H2 = w1_ref.shape[1]
    H = H2 // 2
    M = TB * N

    # Flatten nodes within the tile (merges leading dims only; lane dim unchanged,
    # N is a multiple of 8 so this is relayout-free).
    x = u_ref[...].reshape(M, F)                                  # (M, F)

    # ---- layer 1 (F -> 2H): F=4 -> VPU broadcast-FMA accumulation, no MXU pass ----
    w1 = w1_ref[...]
    h = x[:, 0:1] * w1[0:1, :] + b1_ref[...]
    for f in range(1, F):                                         # static unroll (F=4)
        h = h + x[:, f:f + 1] * w1[f:f + 1, :]
    h0 = jnp.tanh(h)                                              # [m0 | a0]  (M, 2H)

    # ---- layer 2 (both branches fused via block-diag weight, residual) ------------
    h1 = jnp.tanh(jnp.dot(h0, w2_ref[...], preferred_element_type=jnp.float32)
                  + b2_ref[...]) + h0                             # [m1 | a1]

    # ---- layer 3 (fused; main half: tanh + residual, attn half: plain linear) -----
    z = jnp.dot(h1, w3_ref[...], preferred_element_type=jnp.float32) + b3_ref[...]
    x_main = (jnp.tanh(z[:, :H]) + h1[:, :H]).reshape(TB, N, H)   # (TB, N, H)
    logits = z[:, H:].reshape(TB, N, H)                           # (TB, N, H)

    # ---- masked softmax over nodes (dim=1) + weighted aggregation -----------------
    valid = mask_ref[...][:, :, None] != 0.0                      # (TB, N, 1)
    logits = jnp.where(valid, logits, jnp.float32(-1e30))
    logits = logits - jnp.max(logits, axis=1, keepdims=True)
    e = jnp.exp(logits)
    attn = e / jnp.sum(e, axis=1, keepdims=True)
    agg = jnp.sum(x_main * attn, axis=1)                          # (TB, H)

    # ---- after-aggregation residual MLP --------------------------------------------
    wa = wa_ref[...]
    ba = ba_ref[...]
    y = agg
    for l in range(3):                                            # static unroll
        y = jnp.tanh(jnp.dot(y, wa[l], preferred_element_type=jnp.float32)
                     + ba[l:l + 1, :]) + y

    # ---- regression head: VPU multiply + lane reduce (avoids (H,1) MXU pass) -------
    out_ref[...] = jnp.sum(y * wr_ref[...], axis=-1, keepdims=True) + br_ref[...]


# --------------------------------------------------------------------------
# Wrapper: batch tiling, padding, BlockSpecs.
#   tb: batch tile. Pick the largest tile whose double-buffered footprint
#       (u tile + ~10 live (tb*N, 2H) f32 intermediates) fits the per-gen VMEM
#       budget; use roughly half the v6e tile on v7x (64 MiB vs 128 MiB VMEM).
# --------------------------------------------------------------------------
def spatial_regressor3(u, mask, folded, *, tb=8, vmem_limit_bytes=32 * 1024 * 1024):
    B, N, F = u.shape
    H = folded["wa"].shape[-1]
    H2 = 2 * H

    mask2d = mask.reshape(B, N).astype(jnp.float32)               # lane-dense mask

    G = pl.cdiv(B, tb)
    Bp = G * tb
    if Bp != B:                                                   # pad batch to tile multiple
        u = jnp.concatenate([u, jnp.zeros((Bp - B, N, F), u.dtype)], axis=0)
        mask2d = jnp.concatenate(
            [mask2d, jnp.ones((Bp - B, N), mask2d.dtype)], axis=0)

    def const_spec(shape):                                        # VMEM-resident weights
        nd = len(shape)
        return pl.BlockSpec(shape, lambda i, nd=nd: (0,) * nd)

    out = pl.pallas_call(
        _spatial_regressor3_kernel,
        out_shape=jax.ShapeDtypeStruct((Bp, 1), jnp.float32),
        grid=(G,),
        in_specs=[
            pl.BlockSpec((tb, N, F), lambda i: (i, 0, 0)),        # u
            pl.BlockSpec((tb, N), lambda i: (i, 0)),              # mask
            const_spec((F, H2)), const_spec((1, H2)),             # layer 1
            const_spec((H2, H2)), const_spec((1, H2)),            # layer 2
            const_spec((H2, H2)), const_spec((1, H2)),            # layer 3
            const_spec((3, H, H)), const_spec((3, H)),            # after-aggr
            const_spec((1, H)), const_spec((1, 1)),               # head
        ],
        out_specs=pl.BlockSpec((tb, 1), lambda i: (i, 0)),
        compiler_params=pltpu.CompilerParams(
            dimension_semantics=("parallel",),                    # independent batch tiles
            vmem_limit_bytes=vmem_limit_bytes,
        ),
    )(u, mask2d, folded["w1"], folded["b1"], folded["w2"], folded["b2"],
      folded["w3"], folded["b3"], folded["wa"], folded["ba"],
      folded["wr"], folded["br"])

    return out[:B]


# --------------------------------------------------------------------------
# Deterministic synthetic parameters (PyTorch-layout, eval-mode BN as scale/shift).
# Linear weights are stored as (in, out) so x @ W == x @ W_torch.T.
# --------------------------------------------------------------------------
def make_raw_params(key, F, H):
    ks = jax.random.split(key, 13)

    def lin(k, fan_in, fan_out):
        lim = 1.0 / jnp.sqrt(fan_in)
        return jax.random.uniform(k, (fan_in, fan_out), jnp.float32, -lim, lim)

    def bn(k, n, C):
        k1, k2, k3, k4 = jax.random.split(k, 4)
        gamma = 1.0 + 0.1 * jax.random.normal(k1, (n, C), jnp.float32)
        beta = 0.1 * jax.random.normal(k2, (n, C), jnp.float32)
        mean = 0.1 * jax.random.normal(k3, (n, C), jnp.float32)
        var = 1.0 + 0.1 * jax.random.uniform(k4, (n, C), jnp.float32)
        scale = gamma / jnp.sqrt(var + 1e-5)
        shift = beta - mean * scale
        return scale, shift

    wF = jnp.stack([lin(ks[0], F, H), lin(ks[1], F, H)])           # [linear1_before, linear1_attn]
    # order: [12_before, 2_before, 12_attn, 2_attn, 1_after, 12_after, 2_after]
    wH = jnp.stack([lin(ks[2 + i], H, H) for i in range(7)])
    wr = lin(ks[9], H, 1)
    br = (jax.random.uniform(ks[10], (1, 1), jnp.float32, -1.0, 1.0) / jnp.sqrt(H))

    bnF_s, bnF_b = bn(ks[11], 2, F)   # [bn1_before_aggr, bn1_attn]
    bnH_s, bnH_b = bn(ks[12], 8, H)   # [12_before, 2_before, 12_attn, 2_attn, 1_after, 12_after, 2_after, 3_after]

    return dict(wF=wF, wH=wH, wr=wr, br=br,
                bnF_s=bnF_s, bnF_b=bnF_b, bnH_s=bnH_s, bnH_b=bnH_b)


# --------------------------------------------------------------------------
# Host-side fold: BN into weights, concatenate / block-diagonalize the two branches.
# --------------------------------------------------------------------------
def fold_params(raw):
    wF, wH, wr, br = raw["wF"], raw["wH"], raw["wr"], raw["br"]
    sF, bF = raw["bnF_s"], raw["bnF_b"]
    sH, bH = raw["bnH_s"], raw["bnH_b"]

    def fold(s, b, w):                          # (x*s+b)@w == x@(s[:,None]*w) + b@w
        return w * s[:, None], b[None, :] @ w

    def block_diag(a, c):
        za = jnp.zeros((a.shape[0], c.shape[1]), a.dtype)
        zc = jnp.zeros((c.shape[0], a.shape[1]), a.dtype)
        return jnp.concatenate([jnp.concatenate([a, za], axis=1),
                                jnp.concatenate([zc, c], axis=1)], axis=0)

    w1m, b1m = fold(sF[0], bF[0], wF[0])        # linear1_before_aggr
    w1a, b1a = fold(sF[1], bF[1], wF[1])        # linear1_attn
    w1 = jnp.concatenate([w1m, w1a], axis=1)    # (F, 2H)
    b1 = jnp.concatenate([b1m, b1a], axis=1)

    w2m, b2m = fold(sH[0], bH[0], wH[0])        # linear12_before_aggr
    w2a, b2a = fold(sH[2], bH[2], wH[2])        # linear12_attn
    w2 = block_diag(w2m, w2a)
    b2 = jnp.concatenate([b2m, b2a], axis=1)

    w3m, b3m = fold(sH[1], bH[1], wH[1])        # linear2_before_aggr
    w3a, b3a = fold(sH[3], bH[3], wH[3])        # linear2_attn
    w3 = block_diag(w3m, w3a)
    b3 = jnp.concatenate([b3m, b3a], axis=1)

    wa_list, ba_list = [], []
    for i in (4, 5, 6):                         # 1_after, 12_after, 2_after
        w_, b_ = fold(sH[i], bH[i], wH[i])
        wa_list.append(w_)
        ba_list.append(b_[0])
    wa = jnp.stack(wa_list)                     # (3, H, H)
    ba = jnp.stack(ba_list)                     # (3, H)

    wr_row = (sH[7] * wr[:, 0])[None, :]        # (1, H)   bn3_after scale folded
    br_f = bH[7][None, :] @ wr + br             # (1, 1)   bn3_after shift folded

    return dict(w1=w1, b1=b1, w2=w2, b2=b2, w3=w3, b3=b3,
                wa=wa, ba=ba, wr=wr_row, br=br_f)


# --------------------------------------------------------------------------
# Plain-JAX reference (mirrors the PyTorch forward in eval mode, unfused params).
# --------------------------------------------------------------------------
def reference(u, mask, raw):
    B, N, F = u.shape
    H = raw["wH"].shape[-1]
    x = u.reshape(-1, F)
    sF, bF = raw["bnF_s"], raw["bnF_b"]
    sH, bH = raw["bnH_s"], raw["bnH_b"]
    wF, wH = raw["wF"], raw["wH"]

    m0 = jnp.tanh((x * sF[0] + bF[0]) @ wF[0])
    m1 = jnp.tanh((m0 * sH[0] + bH[0]) @ wH[0]) + m0
    m2 = jnp.tanh((m1 * sH[1] + bH[1]) @ wH[1]) + m1
    x_main = m2.reshape(B, N, H)

    a0 = jnp.tanh((x * sF[1] + bF[1]) @ wF[1])
    a1 = jnp.tanh((a0 * sH[2] + bH[2]) @ wH[2]) + a0
    a2 = ((a1 * sH[3] + bH[3]) @ wH[3]).reshape(B, N, H)
    a2 = jnp.where(mask == 0.0, -jnp.inf, a2)
    a2 = a2 - jnp.max(a2, axis=1, keepdims=True)
    e = jnp.exp(a2)
    attn = e / jnp.sum(e, axis=1, keepdims=True)

    agg = jnp.sum(x_main * attn, axis=1)

    y0 = jnp.tanh((agg * sH[4] + bH[4]) @ wH[4]) + agg
    y1 = jnp.tanh((y0 * sH[5] + bH[5]) @ wH[5]) + y0
    y2 = jnp.tanh((y1 * sH[6] + bH[6]) @ wH[6]) + y1
    return (y2 * sH[7] + bH[7]) @ raw["wr"] + raw["br"]


if __name__ == "__main__":
    # B deliberately not a multiple of the batch tile to exercise padding + a 2-step grid.
    B, N, F, H = 12, 16, 4, 32

    key = jax.random.PRNGKey(0)
    ku, km, kp = jax.random.split(key, 3)

    u = jax.random.normal(ku, (B, N, F), jnp.float32)
    mask = (jax.random.uniform(km, (B, N, 1)) > 0.3).astype(jnp.float32)
    mask = mask.at[:, 0, :].set(1.0)  # at least one valid node per sample

    raw = make_raw_params(kp, F, H)
    folded = fold_params(raw)

    out = spatial_regressor3(u, mask, folded, tb=8)
    out = jax.block_until_ready(out)

    ref = reference(u, mask, raw)
    assert out.shape == (B, 1), out.shape
    assert not bool(jnp.any(jnp.isnan(out)))
    assert jnp.allclose(out, ref, rtol=2e-3, atol=2e-3), (out, ref)

    print("KERNEL_OK")
</pallas_src>

<mosaic_0001>
module attributes {stable_mosaic.version = 11 : i64} {
  func.func @_spatial_regressor3_kernel(%arg0: i32, %arg1: memref<8x16x4xf32, #tpu.memory_space<vmem>>, %arg2: memref<8x16xf32, #tpu.memory_space<vmem>>, %arg3: memref<4x64xf32, #tpu.memory_space<vmem>>, %arg4: memref<1x64xf32, #tpu.memory_space<vmem>>, %arg5: memref<64x64xf32, #tpu.memory_space<vmem>>, %arg6: memref<1x64xf32, #tpu.memory_space<vmem>>, %arg7: memref<64x64xf32, #tpu.memory_space<vmem>>, %arg8: memref<1x64xf32, #tpu.memory_space<vmem>>, %arg9: memref<3x32x32xf32, #tpu.memory_space<vmem>>, %arg10: memref<3x32xf32, #tpu.memory_space<vmem>>, %arg11: memref<1x32xf32, #tpu.memory_space<vmem>>, %arg12: memref<1x1xf32, #tpu.memory_space<vmem>>, %arg13: memref<8x1xf32, #tpu.memory_space<vmem>>) attributes {dimension_semantics = [#tpu.dimension_semantics<parallel>], iteration_bounds = array<i64: 2>, scalar_prefetch = 0 : i64, scratch_operands = 0 : i64, tpu.core_type = #tpu.core_type<tc>, window_params = [{transform_indices = @transform_0, window_bounds = array<i64: 8, 16, 4>}, {transform_indices = @transform_1, window_bounds = array<i64: 8, 16>}, {pipeline_mode = #tpu.pipeline_mode<synchronous>, transform_indices = @transform_2, window_bounds = array<i64: 4, 64>}, {pipeline_mode = #tpu.pipeline_mode<synchronous>, transform_indices = @transform_3, window_bounds = array<i64: 1, 64>}, {pipeline_mode = #tpu.pipeline_mode<synchronous>, transform_indices = @transform_4, window_bounds = array<i64: 64, 64>}, {pipeline_mode = #tpu.pipeline_mode<synchronous>, transform_indices = @transform_5, window_bounds = array<i64: 1, 64>}, {pipeline_mode = #tpu.pipeline_mode<synchronous>, transform_indices = @transform_6, window_bounds = array<i64: 64, 64>}, {pipeline_mode = #tpu.pipeline_mode<synchronous>, transform_indices = @transform_7, window_bounds = array<i64: 1, 64>}, {pipeline_mode = #tpu.pipeline_mode<synchronous>, transform_indices = @transform_8, window_bounds = array<i64: 3, 32, 32>}, {pipeline_mode = #tpu.pipeline_mode<synchronous>, transform_indices = @transform_9, window_bounds = array<i64: 3, 32>}, {pipeline_mode = #tpu.pipeline_mode<synchronous>, transform_indices = @transform_10, window_bounds = array<i64: 1, 32>}, {pipeline_mode = #tpu.pipeline_mode<synchronous>, transform_indices = @transform_11, window_bounds = array<i64: 1, 1>}, {transform_indices = @transform_12, window_bounds = array<i64: 8, 1>}]} {
    %c0 = arith.constant 0 : index
    %c0_0 = arith.constant 0 : index
    %c0_1 = arith.constant 0 : index
    %0 = vector.load %arg1[%c0, %c0_0, %c0_1] : memref<8x16x4xf32, #tpu.memory_space<vmem>>, vector<8x16x4xf32>
    %1 = vector.shape_cast %0 : vector<8x16x4xf32> to vector<128x4xf32>
    %c0_2 = arith.constant 0 : index
    %c0_3 = arith.constant 0 : index
    %2 = vector.load %arg3[%c0_2, %c0_3] : memref<4x64xf32, #tpu.memory_space<vmem>>, vector<4x64xf32>
    %3 = vector.extract_strided_slice %1 {offsets = [0, 0], sizes = [128, 1], strides = [1, 1]} : vector<128x4xf32> to vector<128x1xf32>
    %4 = vector.extract_strided_slice %2 {offsets = [0, 0], sizes = [1, 64], strides = [1, 1]} : vector<4x64xf32> to vector<1x64xf32>
    %5 = vector.broadcast %3 : vector<128x1xf32> to vector<128x64xf32>
    %6 = vector.broadcast %4 : vector<1x64xf32> to vector<128x64xf32>
    %7 = arith.mulf %5, %6 : vector<128x64xf32>
    %c0_4 = arith.constant 0 : index
    %c0_5 = arith.constant 0 : index
    %8 = vector.load %arg4[%c0_4, %c0_5] : memref<1x64xf32, #tpu.memory_space<vmem>>, vector<1x64xf32>
    %9 = vector.broadcast %8 : vector<1x64xf32> to vector<128x64xf32>
    %10 = arith.addf %7, %9 : vector<128x64xf32>
    %11 = vector.extract_strided_slice %1 {offsets = [0, 1], sizes = [128, 1], strides = [1, 1]} : vector<128x4xf32> to vector<128x1xf32>
    %12 = vector.extract_strided_slice %2 {offsets = [1, 0], sizes = [1, 64], strides = [1, 1]} : vector<4x64xf32> to vector<1x64xf32>
    %13 = vector.broadcast %11 : vector<128x1xf32> to vector<128x64xf32>
    %14 = vector.broadcast %12 : vector<1x64xf32> to vector<128x64xf32>
    %15 = arith.mulf %13, %14 : vector<128x64xf32>
    %16 = arith.addf %10, %15 : vector<128x64xf32>
    %17 = vector.extract_strided_slice %1 {offsets = [0, 2], sizes = [128, 1], strides = [1, 1]} : vector<128x4xf32> to vector<128x1xf32>
    %18 = vector.extract_strided_slice %2 {offsets = [2, 0], sizes = [1, 64], strides = [1, 1]} : vector<4x64xf32> to vector<1x64xf32>
    %19 = vector.broadcast %17 : vector<128x1xf32> to vector<128x64xf32>
    %20 = vector.broadcast %18 : vector<1x64xf32> to vector<128x64xf32>
    %21 = arith.mulf %19, %20 : vector<128x64xf32>
    %22 = arith.addf %16, %21 : vector<128x64xf32>
    %23 = vector.extract_strided_slice %1 {offsets = [0, 3], sizes = [128, 1], strides = [1, 1]} : vector<128x4xf32> to vector<128x1xf32>
    %24 = vector.extract_strided_slice %2 {offsets = [3, 0], sizes = [1, 64], strides = [1, 1]} : vector<4x64xf32> to vector<1x64xf32>
    %25 = vector.broadcast %23 : vector<128x1xf32> to vector<128x64xf32>
    %26 = vector.broadcast %24 : vector<1x64xf32> to vector<128x64xf32>
    %27 = arith.mulf %25, %26 : vector<128x64xf32>
    %28 = arith.addf %22, %27 : vector<128x64xf32>
    %29 = math.tanh %28 : vector<128x64xf32>
    %c0_6 = arith.constant 0 : index
    %c0_7 = arith.constant 0 : index
    %30 = vector.load %arg5[%c0_6, %c0_7] : memref<64x64xf32, #tpu.memory_space<vmem>>, vector<64x64xf32>
    %cst = arith.constant dense<0.000000e+00> : vector<128x64xf32>
    %31 = tpu.matmul %29, %30, %cst {dimension_numbers = #tpu.dot_dimension_numbers<[1], [0], [0], [1], [0, 0, 1, 1], [], []>} : vector<128x64xf32>, vector<64x64xf32>, vector<128x64xf32> -> vector<128x64xf32>
    %c0_8 = arith.constant 0 : index
    %c0_9 = arith.constant 0 : index
    %32 = vector.load %arg6[%c0_8, %c0_9] : memref<1x64xf32, #tpu.memory_space<vmem>>, vector<1x64xf32>
    %33 = vector.broadcast %32 : vector<1x64xf32> to vector<128x64xf32>
    %34 = arith.addf %31, %33 : vector<128x64xf32>
    %35 = math.tanh %34 : vector<128x64xf32>
    %36 = arith.addf %35, %29 : vector<128x64xf32>
    %c0_10 = arith.constant 0 : index
    %c0_11 = arith.constant 0 : index
    %37 = vector.load %arg7[%c0_10, %c0_11] : memref<64x64xf32, #tpu.memory_space<vmem>>, vector<64x64xf32>
    %cst_12 = arith.constant dense<0.000000e+00> : vector<128x64xf32>
    %38 = tpu.matmul %36, %37, %cst_12 {dimension_numbers = #tpu.dot_dimension_numbers<[1], [0], [0], [1], [0, 0, 1, 1], [], []>} : vector<128x64xf32>, vector<64x64xf32>, vector<128x64xf32> -> vector<128x64xf32>
    %c0_13 = arith.constant 0 : index
    %c0_14 = arith.constant 0 : index
    %39 = vector.load %arg8[%c0_13, %c0_14] : memref<1x64xf32, #tpu.memory_space<vmem>>, vector<1x64xf32>
    %40 = vector.broadcast %39 : vector<1x64xf32> to vector<128x64xf32>
    %41 = arith.addf %38, %40 : vector<128x64xf32>
    %42 = vector.extract_strided_slice %41 {offsets = [0, 0], sizes = [128, 32], strides = [1, 1]} : vector<128x64xf32> to vector<128x32xf32>
    %43 = math.tanh %42 : vector<128x32xf32>
    %44 = vector.extract_strided_slice %36 {offsets = [0, 0], sizes = [128, 32], strides = [1, 1]} : vector<128x64xf32> to vector<128x32xf32>
    %45 = arith.addf %43, %44 : vector<128x32xf32>
    %46 = vector.shape_cast %45 : vector<128x32xf32> to vector<8x16x32xf32>
    %47 = vector.extract_strided_slice %41 {offsets = [0, 32], sizes = [128, 32], strides = [1, 1]} : vector<128x64xf32> to vector<128x32xf32>
    %48 = vector.shape_cast %47 : vector<128x32xf32> to vector<8x16x32xf32>
    %c0_15 = arith.constant 0 : index
    %c0_16 = arith.constant 0 : index
    %49 = vector.load %arg2[%c0_15, %c0_16] : memref<8x16xf32, #tpu.memory_space<vmem>>, vector<8x16xf32>
    %50 = vector.shape_cast %49 : vector<8x16xf32> to vector<8x16x1xf32>
    %cst_17 = arith.constant 0.000000e+00 : f32
    %51 = vector.broadcast %cst_17 : f32 to vector<8x16x1xf32>
    %52 = arith.cmpf one, %50, %51 : vector<8x16x1xf32>
    %cst_18 = arith.constant -1.000000e+30 : f32
    %53 = vector.shape_cast %52 : vector<8x16x1xi1> to vector<8x16x1xi1>
    %54 = vector.broadcast %53 : vector<8x16x1xi1> to vector<8x16x32xi1>
    %55 = vector.broadcast %cst_18 : f32 to vector<8x16x32xf32>
    %56 = arith.select %54, %48, %55 : vector<8x16x32xi1>, vector<8x16x32xf32>
    %cst_19 = arith.constant dense<0xFF800000> : vector<8x32xf32>
    %57 = vector.multi_reduction <maximumf>, %56, %cst_19 [1] : vector<8x16x32xf32> to vector<8x32xf32>
    %58 = vector.shape_cast %57 : vector<8x32xf32> to vector<8x1x32xf32>
    %59 = vector.broadcast %58 : vector<8x1x32xf32> to vector<8x16x32xf32>
    %60 = arith.subf %56, %59 : vector<8x16x32xf32>
    %61 = math.exp %60 : vector<8x16x32xf32>
    %cst_20 = arith.constant dense<0.000000e+00> : vector<8x32xf32>
    %62 = vector.multi_reduction <add>, %61, %cst_20 [1] : vector<8x16x32xf32> to vector<8x32xf32>
    %63 = vector.shape_cast %62 : vector<8x32xf32> to vector<8x1x32xf32>
    %64 = vector.broadcast %63 : vector<8x1x32xf32> to vector<8x16x32xf32>
    %65 = arith.divf %61, %64 : vector<8x16x32xf32>
    %66 = arith.mulf %46, %65 : vector<8x16x32xf32>
    %cst_21 = arith.constant dense<0.000000e+00> : vector<8x32xf32>
    %67 = vector.multi_reduction <add>, %66, %cst_21 [1] : vector<8x16x32xf32> to vector<8x32xf32>
    %c0_22 = arith.constant 0 : index
    %c0_23 = arith.constant 0 : index
    %c0_24 = arith.constant 0 : index
    %68 = vector.load %arg9[%c0_22, %c0_23, %c0_24] : memref<3x32x32xf32, #tpu.memory_space<vmem>>, vector<3x32x32xf32>
    %c0_25 = arith.constant 0 : index
    %c0_26 = arith.constant 0 : index
    %69 = vector.load %arg10[%c0_25, %c0_26] : memref<3x32xf32, #tpu.memory_space<vmem>>, vector<3x32xf32>
    %70 = vector.extract_strided_slice %68 {offsets = [0, 0, 0], sizes = [1, 32, 32], strides = [1, 1, 1]} : vector<3x32x32xf32> to vector<1x32x32xf32>
    %71 = vector.shape_cast %70 : vector<1x32x32xf32> to vector<32x32xf32>
    %cst_27 = arith.constant dense<0.000000e+00> : vector<8x32xf32>
    %72 = tpu.matmul %67, %71, %cst_27 {dimension_numbers = #tpu.dot_dimension_numbers<[1], [0], [0], [1], [0, 0, 1, 1], [], []>} : vector<8x32xf32>, vector<32x32xf32>, vector<8x32xf32> -> vector<8x32xf32>
    %73 = vector.extract_strided_slice %69 {offsets = [0, 0], sizes = [1, 32], strides = [1, 1]} : vector<3x32xf32> to vector<1x32xf32>
    %74 = vector.broadcast %73 : vector<1x32xf32> to vector<8x32xf32>
    %75 = arith.addf %72, %74 : vector<8x32xf32>
    %76 = math.tanh %75 : vector<8x32xf32>
    %77 = arith.addf %76, %67 : vector<8x32xf32>
    %78 = vector.extract_strided_slice %68 {offsets = [1, 0, 0], sizes = [1, 32, 32], strides = [1, 1, 1]} : vector<3x32x32xf32> to vector<1x32x32xf32>
    %79 = vector.shape_cast %78 : vector<1x32x32xf32> to vector<32x32xf32>
    %cst_28 = arith.constant dense<0.000000e+00> : vector<8x32xf32>
    %80 = tpu.matmul %77, %79, %cst_28 {dimension_numbers = #tpu.dot_dimension_numbers<[1], [0], [0], [1], [0, 0, 1, 1], [], []>} : vector<8x32xf32>, vector<32x32xf32>, vector<8x32xf32> -> vector<8x32xf32>
    %81 = vector.extract_strided_slice %69 {offsets = [1, 0], sizes = [1, 32], strides = [1, 1]} : vector<3x32xf32> to vector<1x32xf32>
    %82 = vector.broadcast %81 : vector<1x32xf32> to vector<8x32xf32>
    %83 = arith.addf %80, %82 : vector<8x32xf32>
    %84 = math.tanh %83 : vector<8x32xf32>
    %85 = arith.addf %84, %77 : vector<8x32xf32>
    %86 = vector.extract_strided_slice %68 {offsets = [2, 0, 0], sizes = [1, 32, 32], strides = [1, 1, 1]} : vector<3x32x32xf32> to vector<1x32x32xf32>
    %87 = vector.shape_cast %86 : vector<1x32x32xf32> to vector<32x32xf32>
    %cst_29 = arith.constant dense<0.000000e+00> : vector<8x32xf32>
    %88 = tpu.matmul %85, %87, %cst_29 {dimension_numbers = #tpu.dot_dimension_numbers<[1], [0], [0], [1], [0, 0, 1, 1], [], []>} : vector<8x32xf32>, vector<32x32xf32>, vector<8x32xf32> -> vector<8x32xf32>
    %89 = vector.extract_strided_slice %69 {offsets = [2, 0], sizes = [1, 32], strides = [1, 1]} : vector<3x32xf32> to vector<1x32xf32>
    %90 = vector.broadcast %89 : vector<1x32xf32> to vector<8x32xf32>
    %91 = arith.addf %88, %90 : vector<8x32xf32>
    %92 = math.tanh %91 : vector<8x32xf32>
    %93 = arith.addf %92, %85 : vector<8x32xf32>
    %c0_30 = arith.constant 0 : index
    %c0_31 = arith.constant 0 : index
    %94 = vector.load %arg11[%c0_30, %c0_31] : memref<1x32xf32, #tpu.memory_space<vmem>>, vector<1x32xf32>
    %95 = vector.broadcast %94 : vector<1x32xf32> to vector<8x32xf32>
    %96 = arith.mulf %93, %95 : vector<8x32xf32>
    %cst_32 = arith.constant dense<0.000000e+00> : vector<8xf32>
    %97 = vector.multi_reduction <add>, %96, %cst_32 [1] : vector<8x32xf32> to vector<8xf32>
    %98 = vector.shape_cast %97 : vector<8xf32> to vector<8x1xf32>
    %c0_33 = arith.constant 0 : index
    %c0_34 = arith.constant 0 : index
    %99 = vector.load %arg12[%c0_33, %c0_34] : memref<1x1xf32, #tpu.memory_space<vmem>>, vector<1x1xf32>
    %100 = vector.broadcast %99 : vector<1x1xf32> to vector<8x1xf32>
    %101 = arith.addf %98, %100 : vector<8x1xf32>
    %c0_35 = arith.constant 0 : index
    %c0_36 = arith.constant 0 : index
    %102 = vector.load %arg13[%c0_35, %c0_36] : memref<8x1xf32, #tpu.memory_space<vmem>>, vector<8x1xf32>
    tpu.vector_store %arg13[%c0_35, %c0_36], %101 {strides = array<i32>} : memref<8x1xf32, #tpu.memory_space<vmem>>, vector<8x1xf32>,
    return
  }
  func.func @transform_0(%arg0: i32) -> (i32, i32, i32) {
    %c0_i32 = arith.constant 0 : i32
    %c0_i32_0 = arith.constant 0 : i32
    %c0_i32_1 = arith.constant 0 : i32
    return %arg0, %c0_i32, %c0_i32_0 : i32, i32, i32
  }
  func.func @transform_1(%arg0: i32) -> (i32, i32) {
    %c0_i32 = arith.constant 0 : i32
    %c0_i32_0 = arith.constant 0 : i32
    return %arg0, %c0_i32 : i32, i32
  }
  func.func @transform_2(%arg0: i32) -> (i32, i32) {
    %c0_i32 = arith.constant 0 : i32
    %c0_i32_0 = arith.constant 0 : i32
    %c0_i32_1 = arith.constant 0 : i32
    return %c0_i32, %c0_i32_0 : i32, i32
  }
  func.func @transform_3(%arg0: i32) -> (i32, i32) {
    %c0_i32 = arith.constant 0 : i32
    %c0_i32_0 = arith.constant 0 : i32
    %c0_i32_1 = arith.constant 0 : i32
    return %c0_i32, %c0_i32_0 : i32, i32
  }
  func.func @transform_4(%arg0: i32) -> (i32, i32) {
    %c0_i32 = arith.constant 0 : i32
    %c0_i32_0 = arith.constant 0 : i32
    %c0_i32_1 = arith.constant 0 : i32
    return %c0_i32, %c0_i32_0 : i32, i32
  }
  func.func @transform_5(%arg0: i32) -> (i32, i32) {
    %c0_i32 = arith.constant 0 : i32
    %c0_i32_0 = arith.constant 0 : i32
    %c0_i32_1 = arith.constant 0 : i32
    return %c0_i32, %c0_i32_0 : i32, i32
  }
  func.func @transform_6(%arg0: i32) -> (i32, i32) {
    %c0_i32 = arith.constant 0 : i32
    %c0_i32_0 = arith.constant 0 : i32
    %c0_i32_1 = arith.constant 0 : i32
    return %c0_i32, %c0_i32_0 : i32, i32
  }
  func.func @transform_7(%arg0: i32) -> (i32, i32) {
    %c0_i32 = arith.constant 0 : i32
    %c0_i32_0 = arith.constant 0 : i32
    %c0_i32_1 = arith.constant 0 : i32
    return %c0_i32, %c0_i32_0 : i32, i32
  }
  func.func @transform_8(%arg0: i32) -> (i32, i32, i32) {
    %c0_i32 = arith.constant 0 : i32
    %c0_i32_0 = arith.constant 0 : i32
    %c0_i32_1 = arith.constant 0 : i32
    %c0_i32_2 = arith.constant 0 : i32
    return %c0_i32, %c0_i32_0, %c0_i32_1 : i32, i32, i32
  }
  func.func @transform_9(%arg0: i32) -> (i32, i32) {
    %c0_i32 = arith.constant 0 : i32
    %c0_i32_0 = arith.constant 0 : i32
    %c0_i32_1 = arith.constant 0 : i32
    return %c0_i32, %c0_i32_0 : i32, i32
  }
  func.func @transform_10(%arg0: i32) -> (i32, i32) {
    %c0_i32 = arith.constant 0 : i32
    %c0_i32_0 = arith.constant 0 : i32
    %c0_i32_1 = arith.constant 0 : i32
    return %c0_i32, %c0_i32_0 : i32, i32
  }
  func.func @transform_11(%arg0: i32) -> (i32, i32) {
    %c0_i32 = arith.constant 0 : i32
    %c0_i32_0 = arith.constant 0 : i32
    %c0_i32_1 = arith.constant 0 : i32
    return %c0_i32, %c0_i32_0 : i32, i32
  }
  func.func @transform_12(%arg0: i32) -> (i32, i32) {
    %c0_i32 = arith.constant 0 : i32
    %c0_i32_0 = arith.constant 0 : i32
    return %arg0, %c0_i32 : i32, i32
  }
}

</mosaic_0001>

<bundles_post_ra>
// kernel: tpu_custom_call.1
= control target key start
LH: loop header
LB: loop body
LE: loop exit
PB: predicated region body
PF: predicated region fallthrough
CT: control target
= control target key end

     0   :  { %s2818_s23 = smov 0   ;;  %s3551_s0 = inlined_call_operand.vmem [shape: f32[16,16,4], index: 0, kind: input, shape index: {}]   ;;  %s3552_s1 = inlined_call_operand.vmem [shape: f32[16,16], index: 1, kind: input, shape index: {}]   ;;  %s3553_s2 = inlined_call_operand.vmem [shape: f32[4,64], index: 2, kind: input, shape index: {}]   ;;  %s3554_s3 = inlined_call_operand.vmem [shape: f32[1,64], index: 3, kind: input, shape index: {}]   ;;  %s3555_s4 = inlined_call_operand.vmem [shape: f32[64,64], index: 4, kind: input, shape index: {}]   ;;  %s3556_s5 = inlined_call_operand.vmem [shape: f32[1,64], index: 5, kind: input, shape index: {}]   ;;  %s3557_s6 = inlined_call_operand.vmem [shape: f32[64,64], index: 6, kind: input, shape index: {}]   ;;  %s3558_s7 = inlined_call_operand.vmem [shape: f32[1,64], index: 7, kind: input, shape index: {}]   ;;  %s3559_s8 = inlined_call_operand.vmem [shape: f32[3,32,32], index: 8, kind: input, shape index: {}]   ;;  %s3560_s9 = inlined_call_operand.vmem [shape: f32[3,32], index: 9, kind: input, shape index: {}]   ;;  %s3561_s10 = inlined_call_operand.vmem [shape: f32[1,32], index: 10, kind: input, shape index: {}]   ;;  %s3562_s11 = inlined_call_operand.<no memory space> [shape: f32[1,1], index: 11, kind: input, shape index: {}]   ;;  %s3563_s12 = inlined_call_operand.vmem [shape: f32[16,1], index: 12, kind: output, shape index: {}]  }
   0x1   :  { %v17_v0 = vstv %s3562_s11 }
   0x2   :  { %18 = vst [vmem:[#allocation2] sm:$0x1] %v17_v0 }
   0x3 LB: > { %s2824_s24 = sadd.s32 4294967295, %s2740_s23   ;;  %p2258_p0 = scmp.ge.s32.totalorder %s2740_s23, 1  ;;  %s2740_s23 = sphi %s2818_s23, %s24_s23  }
   0x4   : > { %p375_p1 = scmp.lt.s32.totalorder %s2740_s23, 3 }
   0x6   : > { %p376_p2 = pnand %p2258_p0, %p375_p1 }
   0x7   : > { %s2259_s25 = sshll.u32 (!%p376_p2), %s2824_s24, 3  ;;  %v2742_v1 = vmov (!%p376_p2), 3   ;;  %v2743_v2 = vmov (!%p376_p2), 1   ;;  %v2744_v7 = vmov (!%p376_p2), 2   ;;  %v2745_v9 = vmov (!%p376_p2), 0   ;;  %v892_v11 = vld [vmem:[%s3555_s4] sm:$0xff] (!%p376_p2) }
   0x8   : > { %379 = sbr.rel (%p376_p2) target bundleno = 1818 (0x71a), region = 68  ;;  %2553 = vset.pattern.permute.xlu0 (!%p376_p2), %v2742_v1  ;;  %2549 = vset.pattern.permute.xlu1 (!%p376_p2), %v2743_v2  ;;  %p422_p3 = scmp.lt.s32.totalorder (!%p376_p2), %s2259_s25, 15  ;;  %v893_v12 = vld [vmem:[%s3555_s4 + $0x8] sm:$0xff] (!%p376_p2)  ;;  %v894_v15 = vld [vmem:[%s3555_s4 + $0x10] sm:$0xff] (!%p376_p2)  ;;  %v895_v16 = vld [vmem:[%s3555_s4 + $0x18] sm:$0xff] (!%p376_p2)  ;;  %v533_v34 = vlaneseq (!%p376_p2)  ;;  %vm907_vm0 = vcmask (!%p376_p2), 523264  }
   0x9   : > { %v2483_v13 = vpack.c.bf16 (!%p376_p2), %v893_v12, %v892_v11  ;;  %v2487_v17 = vpack.c.bf16 (!%p376_p2), %v895_v16, %v894_v15  ;;  %v896_v19 = vld [vmem:[%s3555_s4 + $0x20] sm:$0xff] (!%p376_p2)  ;;  %v897_v20 = vld [vmem:[%s3555_s4 + $0x28] sm:$0xff] (!%p376_p2)  ;;  %v898_v23 = vld [vmem:[%s3555_s4 + $0x30] sm:$0xff] (!%p376_p2)  ;;  %p428_p4 = scmp.lt.s32.totalorder (!%p376_p2), %s2824_s24, 1  ;;  %vm1526_vm2 = vcmask (!%p376_p2), 523520   ;;  %s2746_s21 = smov (!%p376_p2), 96  }
   0xa   : > { %v2491_v21 = vpack.c.bf16 (!%p376_p2), %v897_v20, %v896_v19  ;;  %v899_v24 = vld [vmem:[%s3555_s4 + $0x38] sm:$0xff] (!%p376_p2)  ;;  %v2936_v37 = vshrl.u32 (!%p376_p2), %v533_v34, 7  ;;  %v452_v43 = vld [vmem:[%s3553_s2] sm:$0xf] (!%p376_p2) }
   0xb   : > { %2484 = vmatprep.subr.bf16.mxu0 (!%p376_p2), %v2483_v13  ;;  %v2495_v25 = vpack.c.bf16 (!%p376_p2), %v899_v24, %v898_v23  ;;  %v2968_v49 = vld [vmem:[%s3554_s3] ss:$0 sm:$0xff] (!%p376_p2) }
   0xc   : > { %2486 = vmatpush3.bf16.msra.mxu0 (!%p376_p2), %v2483_v13  ;;  %v2943_v40 = vsub.s32 (!%p376_p2), 0, %v2936_v37  ;;  %v2946_v41 = vsub.s32 (!%p376_p2), 1, %v2936_v37  ;;  %v2954_v45 = vsub.s32 (!%p376_p2), 2, %v2936_v37  ;;  %v842_v48 = vsub.s32 (!%p376_p2), 3, %v2936_v37 }
   0xd   : > { %2488 = vmatprep.subr.bf16.mxu0 (!%p376_p2), %v2487_v17 }
   0xe   : > { %v2958_v46 = vrot.slane (!%p376_p2), %v452_v43, %v2943_v40  ;;  %v2962_v47 = vrot.slane (!%p376_p2), %v452_v43, %v2946_v41  ;;  %v2971_v51 = vrot.slane (!%p376_p2), %v452_v43, %v2954_v45  ;;  %v2978_v55 = vrot.slane (!%p376_p2), %v452_v43, %v842_v48 }
   0xf   : > { %s3565_s25 = smov (!%p422_p3, %s2259_s25), 15  ;;  %s3567_s24 = smov (!%p428_p4, %s2824_s24), 1 }
  0x10   : > { %s2306_s11 = sshll.u32 %s3565_s25, 4  ;;  %2490 = vmatpush3.bf16.msra.mxu0 %v2487_v17  ;;  %s2262_s14 = sshll.u32 %s3567_s24, 3 }
  0x11   : > { %s2834_s28 = scalar_lea.vmem %s3551_s0, %s2306_s11  ;;  %2492 = vmatprep.subr.bf16.mxu0 %v2491_v21  ;;  %s431_s16 = scalar_lea.vmem %s3552_s1, %s2262_s14 }
  0x12   : > { %v437_v3 = vld [vmem:[%s2834_s28 + $0x8] sm:$0xff]  ;;  %v436_v4 = vld [vmem:[%s2834_s28] sm:$0xff]  ;;  %v2839_v5 = vld [vmem:[%s2834_s28 + $0x10] sm:$0xff]  ;;  %s435_s20 = scalar_lea.vmem %s3563_s12, %s2262_s14 }
  0x13   : > { %781 = vperm.xlu0 %2553, %v437_v3   ;;  %577 = vperm.xlu1 %2549, %v436_v4   ;;  %v2843_v6 = vld [vmem:[%s2834_s28 + $0x38] sm:$0xff]  ;;  %v2848_v8 = vld [vmem:[%s2834_s28 + $0x40] sm:$0xff]  ;;  %v441_v18 = vld [vmem:[%s2834_s28 + $0x28] sm:$0xff] }
  0x14   : > { %v439_v10 = vld [vmem:[%s2834_s28 + $0x18] sm:$0xff]  ;;  %v440_v14 = vld [vmem:[%s2834_s28 + $0x20] sm:$0xff]  ;;  %v442_v22 = vld [vmem:[%s2834_s28 + $0x30] sm:$0xff]  ;;  %2494 = vmatpush3.bf16.msra.mxu0 %v2491_v21 }
  0x15   : > { %v2887_v26 = vld [vmem:[%s2834_s28 + $0x58] sm:$0xff]  ;;  %2496 = vmatprep.subr.bf16.mxu0 %v2495_v25  ;;  %v2892_v27 = vld [vmem:[%s2834_s28 + $0x60] sm:$0xff]  ;;  %v2909_v28 = vld [vmem:[%s2834_s28 + $0x68] sm:$0xff] }
  0x16   : > { %v445_v29 = vld [vmem:[%s2834_s28 + $0x48] sm:$0xff]  ;;  %v2916_v30 = vld [vmem:[%s2834_s28 + $0x70] sm:$0xff]  ;;  %v451_v15 = vld [vmem:[%s2834_s28 + $0x78] sm:$0xff] }
  0x17   : > { %785 = vperm.xlu0 %2553, %v2839_v5   ;;  %581 = vperm.xlu1 %2549, %v437_v3   ;;  %v446_v31 = vld [vmem:[%s2834_s28 + $0x50] sm:$0xff] }
  0x18   : > { %2498 = vmatpush3.bf16.msra.mxu0 %v2495_v25 }
  0x1b   : > { %805 = vperm.xlu0 %2553, %v2843_v6   ;;  %2550 = vset.pattern.permute.xlu1 %v2744_v7 }
  0x1c   : > { %677 = vperm.xlu1 %2550, %v436_v4  }
  0x1f   : > { %809 = vperm.xlu0 %2553, %v2848_v8  }
  0x20   : > { %681 = vperm.xlu1 %2550, %v437_v3  }
  0x23   : > { %2569 = vset.pattern.permute.xlu0 %v2745_v9 }
  0x24   : > { %455 = vperm.xlu0 %2569, %v436_v4   ;;  %2551 = vset.pattern.permute.xlu1 %v2742_v1 }
  0x25   : > { %777 = vperm.xlu1 %2551, %v436_v4  }
  0x28   : > { %460 = vperm.xlu0 %2569, %v437_v3  }
  0x29   : > { %2552 = vset.pattern.permute.xlu1 %v2743_v2 }
  0x2a   : > { %589 = vperm.xlu1 %2552, %v439_v10  }
  0x2c   : > { %465 = vperm.xlu0 %2569, %v2839_v5  }
  0x2e   : > { %2554 = vset.pattern.permute.xlu1 %v2745_v9 }
  0x2f   : > { %475 = vperm.xlu1 %2554, %v440_v14  }
  0x30   : > { %470 = vperm.xlu0 %2569, %v439_v10  }
  0x33   : > { %2555 = vset.pattern.permute.xlu1 %v2744_v7 }
  0x34   : > { %480 = vperm.xlu0 %2569, %v441_v18   ;;  %685 = vperm.xlu1 %2555, %v2839_v5  }
  0x38   : > { %485 = vperm.xlu0 %2569, %v442_v22   ;;  %689 = vperm.xlu1 %2555, %v439_v10  }
  0x3c   : > { %510 = vperm.xlu0 %2569, %v2887_v26   ;;  %2556 = vset.pattern.permute.xlu1 %v2743_v2 }
  0x3d   : > { %593 = vperm.xlu1 %2556, %v440_v14  }
  0x40   : > { %515 = vperm.xlu0 %2569, %v2892_v27  }
  0x41   : > { %597 = vperm.xlu1 %2556, %v441_v18  }
  0x44   : > { %2571 = vset.pattern.permute.xlu0 %v2744_v7 }
  0x45   : > { %697 = vperm.xlu0 %2571, %v441_v18   ;;  %2557 = vset.pattern.permute.xlu1 %v2742_v1 }
  0x46   : > { %789 = vperm.xlu1 %2557, %v439_v10  }
  0x49   : > { %701 = vperm.xlu0 %2571, %v442_v22  }
  0x4a   : > { %2558 = vset.pattern.permute.xlu1 %v2744_v7 }
  0x4b   : > { %693 = vperm.xlu1 %2558, %v440_v14  }
  0x4d   : > { %721 = vperm.xlu0 %2571, %v2887_v26  }
  0x4f   : > { %2559 = vset.pattern.permute.xlu1 %v2745_v9 }
  0x50   : > { %490 = vperm.xlu1 %2559, %v2843_v6  }
  0x51   : > { %725 = vperm.xlu0 %2571, %v2892_v27  }
  0x54   : > { %2560 = vset.pattern.permute.xlu1 %v2743_v2 }
  0x55   : > { %2577 = vset.pattern.permute.xlu0 %v2743_v2  ;;  %601 = vperm.xlu1 %2560, %v442_v22  }
  0x56   : > { %585 = vperm.xlu0 %2577, %v2839_v5  }
  0x59   : > { %2561 = vset.pattern.permute.xlu1 %v2742_v1 }
  0x5a   : > { %605 = vperm.xlu0 %2577, %v2843_v6   ;;  %793 = vperm.xlu1 %2561, %v440_v14  }
  0x5e   : > { %797 = vperm.xlu1 %2561, %v441_v18   ;;  %609 = vperm.xlu0 %2577, %v2848_v8  }
  0x62   : > { %2562 = vset.pattern.permute.xlu1 %v2745_v9  ;;  %629 = vperm.xlu0 %2577, %v2909_v28  }
  0x63   : > { %495 = vperm.xlu1 %2562, %v2848_v8  }
  0x66   : > { %633 = vperm.xlu0 %2577, %v2916_v30  }
  0x67   : > { %500 = vperm.xlu1 %2562, %v445_v29  }
  0x6a   : > { %2581 = vset.pattern.permute.xlu0 %v2742_v1 }
  0x6b   : > { %2563 = vset.pattern.permute.xlu1 %v2744_v7  ;;  %829 = vperm.xlu0 %2581, %v2909_v28  }
  0x6c   : > { %705 = vperm.xlu1 %2563, %v2843_v6  }
  0x6f   : > { %833 = vperm.xlu0 %2581, %v2916_v30  }
  0x70   : > { %2564 = vset.pattern.permute.xlu1 %v2742_v1 }
  0x71   : > { %801 = vperm.xlu1 %2564, %v442_v22  }
  0x75   : > { %2565 = vset.pattern.permute.xlu1 %v2743_v2 }
  0x76   : > { %613 = vperm.xlu1 %2565, %v445_v29  }
  0x7a   : > { %2566 = vset.pattern.permute.xlu1 %v2745_v9 }
  0x7b   : > { %505 = vperm.xlu1 %2566, %v446_v31  }
  0x7f   : > { %2567 = vset.pattern.permute.xlu1 %v2744_v7 }
  0x80   : > { %709 = vperm.xlu1 %2567, %v2848_v8  }
  0x84   : > { %713 = vperm.xlu1 %2567, %v445_v29  }
  0x88   : > { %2568 = vset.pattern.permute.xlu1 %v2743_v2 }
  0x89   : > { %617 = vperm.xlu1 %2568, %v446_v31  }
  0x8d   : > { %621 = vperm.xlu1 %2568, %v2887_v26  }
  0x91   : > { %2570 = vset.pattern.permute.xlu1 %v2742_v1 }
  0x92   : > { %813 = vperm.xlu1 %2570, %v445_v29   ;;  %v578_v32 = vpop.permute.xlu1 %577  ;;  %v782_v33 = vpop.permute.xlu0 %781 }
  0x93   : > { %v644_v54 = vmul.f32 %v2962_v47, %v578_v32  ;;  %v845_v5 = vmul.f32 %v2978_v55, %v782_v33 }
  0x96   : > { %2572 = vset.pattern.permute.xlu1 %v2744_v7  ;;  %v582_v35 = vpop.permute.xlu1 %581  ;;  %v2934_v36 = vpop.permute.xlu0 %785 }
  0x97   : > { %717 = vperm.xlu1 %2572, %v446_v31   ;;  %v645_v62 = vmul.f32 %v2962_v47, %v582_v35 }
  0x9a   : > { %v2938_v38 = vpop.permute.xlu0 %805 }
  0x9b   : > { %2573 = vset.pattern.permute.xlu1 %v2745_v9  ;;  %v678_v39 = vpop.permute.xlu1 %677 }
  0x9c   : > { %520 = vperm.xlu1 %2573, %v2909_v28   ;;  %v744_v58 = vmul.f32 %v2971_v51, %v678_v39 }
  0x9e   : > { %v2948_v42 = vpop.permute.xlu0 %809 }
  0x9f   : > { %v682_v44 = vpop.permute.xlu1 %681 }
  0xa0   : > { %2574 = vset.pattern.permute.xlu1 %v2743_v2  ;;  %v745_v6 = vmul.f32 %v2971_v51, %v682_v44 }
  0xa1   : > { %625 = vperm.xlu1 %2574, %v2892_v27  }
  0xa3   : > { %v456_v50 = vpop.permute.xlu0 %455 }
  0xa4   : > { %v537_v52 = vmul.f32 %v2958_v46, %v456_v50  ;;  %v778_v53 = vpop.permute.xlu1 %777 }
  0xa5   : > { %2575 = vset.pattern.permute.xlu1 %v2742_v1  ;;  %v844_v0 = vmul.f32 %v2978_v55, %v778_v53 }
  0xa6   : > { %v560_v56 = vadd.f32 %v2968_v49, %v537_v52  ;;  %817 = vperm.xlu1 %2575, %v446_v31  }
  0xa7   : > { %v461_v57 = vpop.permute.xlu0 %460 }
  0xa8   : > { %v660_v59 = vadd.f32 %v644_v54, %v560_v56  ;;  %v538_v60 = vmul.f32 %v2958_v46, %v461_v57  ;;  %v846_v56 = vmul.f32 %v2978_v55, %v2934_v36 }
  0xa9   : > { %v590_v61 = vpop.permute.xlu1 %589 }
  0xaa   : > { %v760_v63 = vadd.f32 %v744_v58, %v660_v59  ;;  %v561_v3 = vadd.f32 %v2968_v49, %v538_v60  ;;  %821 = vperm.xlu1 %2575, %v2887_v26   ;;  %v647_v44 = vmul.f32 %v2962_v47, %v590_v61 }
  0xab   : > { %v466_v4 = vpop.permute.xlu0 %465 }
  0xac   : > { %v860_v8 = vadd.f32 %v844_v0, %v760_v63  ;;  %v661_v10 = vadd.f32 %v645_v62, %v561_v3 }
  0xae   : > { %2584 = vtanh.f32 %v860_v8  ;;  %v761_v11 = vadd.f32 %v745_v6, %v661_v10  ;;  %2576 = vset.pattern.permute.xlu1 %v2745_v9  ;;  %v476_v12 = vpop.permute.xlu1 %475 }
  0xaf   : > { %v471_v13 = vpop.permute.xlu0 %470  ;;  %525 = vperm.xlu1 %2576, %v2916_v30  }
  0xb0   : > { %v861_v14 = vadd.f32 %v845_v5, %v761_v11  ;;  %v540_v31 = vmul.f32 %v2958_v46, %v471_v13 }
  0xb2   : > { %2586 = vtanh.f32 %v861_v14 }
  0xb3   : > { %530 = vperm.xlu1 %2576, %v451_v15   ;;  %v686_v16 = vpop.permute.xlu1 %685  ;;  %v481_v17 = vpop.permute.xlu0 %480 }
  0xb4   : > { %v542_v35 = vmul.f32 %v2958_v46, %v481_v17  ;;  %v746_v57 = vmul.f32 %v2971_v51, %v686_v16 }
  0xb6   : > { %v565_v60 = vadd.f32 %v2968_v49, %v542_v35 }
  0xb7   : > { %2578 = vset.pattern.permute.xlu1 %v2744_v7  ;;  %v690_v18 = vpop.permute.xlu1 %689  ;;  %v2993_v19 = vpop.permute.xlu0 %485 }
  0xb8   : > { %v2995_v20 = vpop.eup %2584  ;;  %729 = vperm.xlu1 %2578, %v2909_v28  }
  0xb9   : > { %2386 = vmatprep.mubr.msk.f32.mxu0 %vm907_vm0, %v2995_v20 }
  0xbb   : > { %v3000_v9 = vpop.permute.xlu0 %510 }
  0xbc   : > { %v3002_v21 = vpop.eup %2586  ;;  %2579 = vset.pattern.permute.xlu1 %v2742_v1  ;;  %v594_v22 = vpop.permute.xlu1 %593 }
  0xbd   : > { %825 = vperm.xlu1 %2579, %v2892_v27   ;;  %2387 = vmatmul.mubr.msk.f32.vlgmr.msra.gmra.mrb[0].mxu0 %vm907_vm0, %v3002_v21  ;;  %v648_v39 = vmul.f32 %v2962_v47, %v594_v22 }
  0xbf   : > { %v3008_v23 = vpop.permute.xlu0 %515 }
  0xc0   : > { %v598_v24 = vpop.permute.xlu1 %597 }
  0xc1   : > { %2580 = vset.pattern.permute.xlu1 %v2743_v2  ;;  %v539_v2 = vmul.f32 %v2958_v46, %v466_v4  ;;  %v649_v62 = vmul.f32 %v2962_v47, %v598_v24 }
  0xc2   : > { %637 = vperm.xlu1 %2580, %v451_v15  }
  0xc3   : > { %v562_v34 = vadd.f32 %v2968_v49, %v539_v2  ;;  %v665_v10 = vadd.f32 %v649_v62, %v565_v60 }
  0xc4   : > { %v698_v25 = vpop.permute.xlu0 %697 }
  0xc5   : > { %v790_v26 = vpop.permute.xlu1 %789  ;;  %v749_v4 = vmul.f32 %v2971_v51, %v698_v25 }
  0xc6   : > { %2582 = vset.pattern.permute.xlu1 %v2744_v7  ;;  %v541_v7 = vmul.f32 %v2958_v46, %v476_v12  ;;  %v847_v59 = vmul.f32 %v2978_v55, %v790_v26 }
  0xc7   : > { %733 = vperm.xlu1 %2582, %v2916_v30   ;;  %v563_v30 = vadd.f32 %v2968_v49, %v540_v31  ;;  %v765_v14 = vadd.f32 %v749_v4, %v665_v10 }
  0xc8   : > { %v3013_v28 = vpop.permute.xlu0 %701  ;;  %v564_v52 = vadd.f32 %v2968_v49, %v541_v7 }
  0xc9   : > { %v663_v58 = vadd.f32 %v647_v44, %v563_v30 }
  0xca   : > { %v694_v29 = vpop.permute.xlu1 %693  ;;  %v664_v61 = vadd.f32 %v648_v39, %v564_v52 }
  0xcb   : > { %737 = vperm.xlu1 %2582, %v451_v15   ;;  %v748_v53 = vmul.f32 %v2971_v51, %v694_v29 }
  0xcc   : > { %v3015_v27 = vpop.permute.xlu0 %721 }
  0xcd   : > { %v764_v5 = vadd.f32 %v748_v53, %v664_v61 }
  0xcf   : > { %2583 = vset.pattern.permute.xlu1 %v2742_v1  ;;  %v491_v32 = vpop.permute.xlu1 %490  ;;  %v747_v1 = vmul.f32 %v2971_v51, %v690_v18  ;;  %v543_v18 = vmul.f32 %v2958_v46, %v2993_v19 }
  0xd0   : > { %837 = vperm.xlu1 %2583, %v451_v15   ;;  %v3020_v33 = vpop.permute.xlu0 %725  ;;  %v544_v24 = vmul.f32 %v2958_v46, %v491_v32 }
  0xd1   : > { %v763_v0 = vadd.f32 %v747_v1, %v663_v58  ;;  %v566_v2 = vadd.f32 %v2968_v49, %v543_v18  ;;  %v851_v1 = vmul.f32 %v2978_v55, %v2938_v38 }
  0xd2   : > { %v567_v19 = vadd.f32 %v2968_v49, %v544_v24 }
  0xd3   : > { %v863_v36 = vadd.f32 %v847_v59, %v763_v0 }
  0xd4   : > { %v602_v43 = vpop.permute.xlu1 %601 }
  0xd5   : > { %v586_v50 = vpop.permute.xlu0 %585  ;;  %v650_v7 = vmul.f32 %v2962_v47, %v602_v43  ;;  %v750_v43 = vmul.f32 %v2971_v51, %v3013_v28 }
  0xd6   : > { %v646_v54 = vmul.f32 %v2962_v47, %v586_v50 }
  0xd7   : > { %v666_v44 = vadd.f32 %v650_v7, %v566_v2 }
  0xd8   : > { %v662_v63 = vadd.f32 %v646_v54, %v562_v34 }
  0xd9   : > { %v794_v3 = vpop.permute.xlu1 %793  ;;  %v606_v22 = vpop.permute.xlu0 %605  ;;  %v766_v53 = vadd.f32 %v750_v43, %v666_v44  ;;  %v1136_v43 = vld [vmem:[%s3557_s6 + $0x18] sm:$0xff]  ;;  %v1137_v44 = vld [vmem:[%s3557_s6 + $0x20] sm:$0xff] }
  0xda   : > { %v762_v6 = vadd.f32 %v746_v57, %v662_v63  ;;  %v848_v8 = vmul.f32 %v2978_v55, %v794_v3  ;;  %v651_v29 = vmul.f32 %v2962_v47, %v606_v22 }
  0xdc   : > { %v862_v11 = vadd.f32 %v846_v56, %v762_v6  ;;  %v864_v12 = vadd.f32 %v848_v8, %v764_v5  ;;  %v667_v35 = vadd.f32 %v651_v29, %v567_v19  ;;  %v852_v5 = vmul.f32 %v2978_v55, %v2948_v42  ;;  %v1134_v29 = vld [vmem:[%s3557_s6 + $0x8] sm:$0xff] }
  0xdd   : > { %v798_v13 = vpop.permute.xlu1 %797  ;;  %v610_v28 = vpop.permute.xlu0 %609 }
  0xde   : > { %2588 = vtanh.f32 %v862_v11  ;;  %v849_v15 = vmul.f32 %v2978_v55, %v798_v13  ;;  %v652_v38 = vmul.f32 %v2962_v47, %v610_v28  ;;  %v548_v11 = vmul.f32 %v2958_v46, %v3000_v9 }
  0xdf   : > { %2590 = vtanh.f32 %v863_v36 }
  0xe0   : > { %2592 = vtanh.f32 %v864_v12  ;;  %v865_v16 = vadd.f32 %v849_v15, %v765_v14  ;;  %v571_v15 = vadd.f32 %v2968_v49, %v548_v11 }
  0xe2   : > { %2594 = vtanh.f32 %v865_v16  ;;  %v496_v17 = vpop.permute.xlu1 %495  ;;  %v755_v16 = vmul.f32 %v2971_v51, %v3015_v27 }
  0xe3   : > { %v545_v59 = vmul.f32 %v2958_v46, %v496_v17 }
  0xe5   : > { %v568_v61 = vadd.f32 %v2968_v49, %v545_v59  ;;  %v549_v59 = vmul.f32 %v2958_v46, %v3008_v23 }
  0xe6   : > { %v501_v25 = vpop.permute.xlu1 %500 }
  0xe7   : > { %v668_v3 = vadd.f32 %v652_v38, %v568_v61  ;;  %v546_v12 = vmul.f32 %v2958_v46, %v501_v25  ;;  %v1133_v25 = vld [vmem:[%s3557_s6] sm:$0xff] }
  0xe8   : > { %v3044_v26 = vpop.eup %2588  ;;  %v2499_v7 = vpack.c.bf16 %v1134_v29, %v1133_v25 }
  0xe9   : > { %v3047_v31 = vpop.eup %2590  ;;  %2389 = vmatprep.mubr.msk.f32.mxu0 %vm907_vm0, %v3044_v26  ;;  %v569_v17 = vadd.f32 %v2968_v49, %v546_v12 }
  0xea   : > { %v3053_v30 = vpop.eup %2592  ;;  %2390 = vmatmul.mubr.msk.f32.gmra.mrb[2].mxu0 %vm907_vm0, %v3047_v31  ;;  %2500 = vmatprep.subr.bf16.mxu1 %v2499_v7 }
  0xeb   : > { %2392 = vmatprep.mubr.msk.f32.mxu0 %vm907_vm0, %v3053_v30  ;;  %v706_v32 = vpop.permute.xlu1 %705  ;;  %2502 = vmatpush3.bf16.msra.mxu1 %v2499_v7 }
  0xec   : > { %v3060_v34 = vpop.eup %2594  ;;  %v751_v39 = vmul.f32 %v2971_v51, %v706_v32 }
  0xee   : > { %v767_v50 = vadd.f32 %v751_v39, %v667_v35  ;;  %2393 = vmatmul.mubr.msk.f32.gmra.mrb[4].mxu0 %vm907_vm0, %v3060_v34  ;;  %v1135_v39 = vld [vmem:[%s3557_s6 + $0x10] sm:$0xff] }
  0xf0   : > { %v802_v52 = vpop.permute.xlu1 %801  ;;  %v867_v56 = vadd.f32 %v851_v1, %v767_v50  ;;  %v2503_v1 = vpack.c.bf16 %v1136_v43, %v1135_v39  ;;  %v1138_v50 = vld [vmem:[%s3557_s6 + $0x28] sm:$0xff] }
  0xf1   : > { %v850_v54 = vmul.f32 %v2978_v55, %v802_v52 }
  0xf2   : > { %2504 = vmatprep.subr.bf16.mxu1 %v2503_v1 }
  0xf3   : > { %v866_v57 = vadd.f32 %v850_v54, %v766_v53  ;;  %v2507_v53 = vpack.c.bf16 %v1138_v50, %v1137_v44  ;;  %v1139_v54 = vld [vmem:[%s3557_s6 + $0x30] sm:$0xff]  ;;  %2506 = vmatpush3.bf16.msra.mxu1 %v2503_v1 }
  0xf5   : > { %2596 = vtanh.f32 %v866_v57  ;;  %v614_v58 = vpop.permute.xlu1 %613  ;;  %2508 = vmatprep.subr.bf16.mxu1 %v2507_v53 }
  0xf6   : > { %2598 = vtanh.f32 %v867_v56  ;;  %v653_v13 = vmul.f32 %v2962_v47, %v614_v58  ;;  %v1140_v56 = vld [vmem:[%s3557_s6 + $0x38] sm:$0xff] }
  0xf7   : > { %v2511_v57 = vpack.c.bf16 %v1140_v56, %v1139_v54  ;;  %2510 = vmatpush3.bf16.msra.mxu1 %v2507_v53 }
  0xf8   : > { %v669_v9 = vadd.f32 %v653_v13, %v569_v17 }
  0xf9   : > { %2512 = vmatprep.subr.bf16.mxu1 %v2511_v57 }
  0xfa   : > { %v506_v60 = vpop.permute.xlu1 %505 }
  0xfb   : > { %v547_v28 = vmul.f32 %v2958_v46, %v506_v60  ;;  %2514 = vmatpush3.bf16.msra.mxu1 %v2511_v57 }
  0xfd   : > { %v570_v23 = vadd.f32 %v2968_v49, %v547_v28 }
  0xff   : > { %v3073_v62 = vpop.eup %2596  ;;  %v710_v63 = vpop.permute.xlu1 %709 }
 0x100   : > { %v3075_v0 = vpop.eup %2598  ;;  %v752_v4 = vmul.f32 %v2971_v51, %v710_v63  ;;  %2395 = vmatprep.mubr.msk.f32.mxu0 %vm907_vm0, %v3073_v62 }
 0x101   : > { %2396 = vmatmul.mubr.msk.f32.gmra.mrb[6].mxu0 %vm907_vm0, %v3075_v0 }
 0x102   : > { %v768_v6 = vadd.f32 %v752_v4, %v668_v3  ;;  %v572_v3 = vadd.f32 %v2968_v49, %v549_v59  ;;  %v756_v4 = vmul.f32 %v2971_v51, %v3020_v33 }
 0x103   : > { %v714_v8 = vpop.permute.xlu1 %713 }
 0x104   : > { %v868_v36 = vadd.f32 %v852_v5, %v768_v6  ;;  %v753_v18 = vmul.f32 %v2971_v51, %v714_v8 }
 0x106   : > { %2600 = vtanh.f32 %v868_v36  ;;  %v769_v19 = vadd.f32 %v753_v18, %v669_v9 }
 0x108   : > { %v618_v10 = vpop.permute.xlu1 %617 }
 0x109   : > { %v654_v38 = vmul.f32 %v2962_v47, %v618_v10 }
 0x10b   : > { %v670_v8 = vadd.f32 %v654_v38, %v570_v23 }
 0x10c   : > { %v622_v14 = vpop.permute.xlu1 %621 }
 0x10d   : > { %v655_v42 = vmul.f32 %v2962_v47, %v622_v14 }
 0x10f   : > { %v671_v22 = vadd.f32 %v655_v42, %v571_v15  ;;  %v630_v42 = vpop.permute.xlu0 %629 }
 0x110   : > { %v3094_v24 = vpop.eup %2600  ;;  %v657_v29 = vmul.f32 %v2962_v47, %v630_v42 }
 0x111   : > { %2398 = vmatprep.mubr.msk.f32.mxu0 %vm907_vm0, %v3094_v24  ;;  %v814_v27 = vpop.permute.xlu1 %813  ;;  %v771_v2 = vadd.f32 %v755_v16, %v671_v22 }
 0x112   : > { %v853_v32 = vmul.f32 %v2978_v55, %v814_v27 }
 0x113   : > { %v634_v22 = vpop.permute.xlu0 %633 }
 0x114   : > { %v869_v35 = vadd.f32 %v853_v32, %v769_v19  ;;  %v658_v56 = vmul.f32 %v2962_v47, %v634_v22 }
 0x116   : > { %2602 = vtanh.f32 %v869_v35  ;;  %v718_v52 = vpop.permute.xlu1 %717 }
 0x117   : > { %v754_v60 = vmul.f32 %v2971_v51, %v718_v52  ;;  %v830_v7 = vpop.permute.xlu0 %829 }
 0x118   : > { %v857_v39 = vmul.f32 %v2978_v55, %v830_v7 }
 0x119   : > { %v770_v11 = vadd.f32 %v754_v60, %v670_v8 }
 0x11b   : > { %v521_v58 = vpop.permute.xlu1 %520  ;;  %v834_v57 = vpop.permute.xlu0 %833 }
 0x11c   : > { %v550_v17 = vmul.f32 %v2958_v46, %v521_v58  ;;  %v858_v38 = vmul.f32 %v2978_v55, %v834_v57 }
 0x11e   : > { %v573_v25 = vadd.f32 %v2968_v49, %v550_v17 }
 0x120   : > { %v3126_v61 = vpop.eup %2602  ;;  %v626_v63 = vpop.permute.xlu1 %625 }
 0x121   : > { %v656_v5 = vmul.f32 %v2962_v47, %v626_v63  ;;  %2399 = vmatmul.mubr.msk.f32.gmra.mrb[8].mxu0 %vm907_vm0, %v3126_v61 }
 0x123   : > { %v672_v6 = vadd.f32 %v656_v5, %v572_v3 }
 0x125   : > { %v818_v36 = vpop.permute.xlu1 %817  ;;  %v772_v10 = vadd.f32 %v756_v4, %v672_v6 }
 0x126   : > { %v854_v12 = vmul.f32 %v2978_v55, %v818_v36 }
 0x128   : > { %v870_v13 = vadd.f32 %v854_v12, %v770_v11 }
 0x129   : > { %v822_v14 = vpop.permute.xlu1 %821 }
 0x12a   : > { %2604 = vtanh.f32 %v870_v13  ;;  %v855_v33 = vmul.f32 %v2978_v55, %v822_v14  ;;  %v3196_v14 = vld [vmem:[%s3556_s5] ss:$0 sm:$0xff] }
 0x12c   : > { %v871_v15 = vadd.f32 %v855_v33, %v771_v2  ;;  %v673_v2 = vadd.f32 %v657_v29, %v573_v25 }
 0x12e   : > { %2606 = vtanh.f32 %v871_v15  ;;  %v526_v16 = vpop.permute.xlu1 %525 }
 0x12f   : > { %v551_v50 = vmul.f32 %v2958_v46, %v526_v16 }
 0x131   : > { %v574_v54 = vadd.f32 %v2968_v49, %v551_v50 }
 0x132   : > { %v531_v18 = vpop.permute.xlu1 %530 }
 0x133   : > { %v674_v59 = vadd.f32 %v658_v56, %v574_v54  ;;  %v552_v63 = vmul.f32 %v2958_v46, %v531_v18 }
 0x134   : > { %v3140_v9 = vpop.eup %2604 }
 0x135   : > { %2401 = vmatprep.mubr.msk.f32.mxu0 %vm907_vm0, %v3140_v9  ;;  %v575_v8 = vadd.f32 %v2968_v49, %v552_v63 }
 0x137   : > { %v730_v27 = vpop.permute.xlu1 %729 }
 0x138   : > { %v3146_v19 = vpop.eup %2606  ;;  %v757_v32 = vmul.f32 %v2971_v51, %v730_v27 }
 0x139   : > { %2402 = vmatmul.mubr.msk.f32.gmra.mrb[10].mxu0 %vm907_vm0, %v3146_v19 }
 0x13a   : > { %v773_v35 = vadd.f32 %v757_v32, %v673_v2 }
 0x13c   : > { %v826_v43 = vpop.permute.xlu1 %825  ;;  %v873_v1 = vadd.f32 %v857_v39, %v773_v35 }
 0x13d   : > { %v856_v44 = vmul.f32 %v2978_v55, %v826_v43 }
 0x13f   : > { %v872_v52 = vadd.f32 %v856_v44, %v772_v10 }
 0x141   : > { %2608 = vtanh.f32 %v872_v52  ;;  %v638_v53 = vpop.permute.xlu1 %637 }
 0x142   : > { %2610 = vtanh.f32 %v873_v1  ;;  %v659_v4 = vmul.f32 %v2962_v47, %v638_v53  ;;  %v1420_v1 = vsub.s32 4, %v2936_v37 }
 0x144   : > { %v675_v46 = vadd.f32 %v659_v4, %v575_v8 }
 0x146   : > { %v734_v58 = vpop.permute.xlu1 %733 }
 0x147   : > { %v758_v28 = vmul.f32 %v2971_v51, %v734_v58 }
 0x149   : > { %v774_v3 = vadd.f32 %v758_v28, %v674_v59 }
 0x14a   : > { %v738_v5 = vpop.permute.xlu1 %737 }
 0x14b   : > { %v3160_v23 = vpop.eup %2608  ;;  %v874_v60 = vadd.f32 %v858_v38, %v774_v3  ;;  %v759_v36 = vmul.f32 %v2971_v51, %v738_v5  ;;  %v3189_v51 = vld [vmem:[%s431_s16] sm:$0xff] }
 0x14c   : > { %v3162_v6 = vpop.eup %2610  ;;  %2404 = vmatprep.mubr.msk.f32.mxu0 %vm907_vm0, %v3160_v23  ;;  %v1388_v29 = vrot.slane %v3189_v51, %v2946_v41  ;;  %v1399_v27 = vrot.slane %v3189_v51, %v2954_v45  ;;  %v1410_v44 = vrot.slane %v3189_v51, %v842_v48  ;;  %v1421_v50 = vrot.slane %v3189_v51, %v1420_v1 }
 0x14d   : > { %2612 = vtanh.f32 %v874_v60  ;;  %2405 = vmatmul.mubr.msk.f32.gmra.mrb[12].mxu0 %vm907_vm0, %v3162_v6  ;;  %v775_v10 = vadd.f32 %v759_v36, %v675_v46 }
 0x14f   : > { %v838_v47 = vpop.permute.xlu1 %837 }
 0x150   : > { %v859_v11 = vmul.f32 %v2978_v55, %v838_v47  ;;  %v1377_v55 = vrot.slane %v3189_v51, %v2943_v40 }
 0x152   : > { %v875_v12 = vadd.f32 %v859_v11, %v775_v10  ;;  %1383 = vbcast.lane.b32.xlu1 %v1377_v55, 264  ;;  %1379 = vbcast.lane.b32.xlu0 %v1377_v55, 256 }
 0x154   : > { %2614 = vtanh.f32 %v875_v12 }
 0x156   : > { %1394 = vbcast.lane.b32.xlu1 %v1388_v29, 264  ;;  %1390 = vbcast.lane.b32.xlu0 %v1388_v29, 256 }
 0x157   : > { %v3171_v13 = vpop.eup %2612 }
 0x158   : > { %2407 = vmatprep.mubr.msk.f32.mxu0 %vm907_vm0, %v3171_v13 }
 0x15a   : > { %1405 = vbcast.lane.b32.xlu1 %v1399_v27, 264  ;;  %1401 = vbcast.lane.b32.xlu0 %v1399_v27, 256 }
 0x15e   : > { %v3175_v49 = vpop.eup %2614  ;;  %1416 = vbcast.lane.b32.xlu1 %v1410_v44, 264  ;;  %1412 = vbcast.lane.b32.xlu0 %v1410_v44, 256 }
 0x15f   : > { %2408 = vmatmul.mubr.msk.f32.gmra.mrb[14].mxu0 %vm907_vm0, %v3175_v49 }
 0x162   : > { %1427 = vbcast.lane.b32.xlu1 %v1421_v50, 264  ;;  %1423 = vbcast.lane.b32.xlu0 %v1421_v50, 256 }
 0x190   : > { %v2388_v33 = vpop.f32.mrb[0].mxu0 }
 0x191   : > { %v1028_v15 = vadd.f32 %v2388_v33, %v3196_v14  ;;  %v1022_v16 = vpop.f32.mrb[1].mxu0 }
 0x192   : > { %v1023_v42 = vadd.f32 %v3196_v14, %v1022_v16 }
 0x193   : > { %2616 = vtanh.f32 %v1028_v15 }
 0x194   : > { %2618 = vtanh.f32 %v1023_v42 }
 0x19d   : > { %v2617_v17 = vpop.eup %2616 }
 0x19e   : > { %v2619_v18 = vpop.eup %2618  ;;  %v3204_v25 = vadd.f32 %v2617_v17, %v3002_v21 }
 0x19f   : > { %v3201_v22 = vadd.f32 %v2619_v18, %v2995_v20 }
 0x1a1   : > { %2426 = vmatprep.mubr.msk.f32.mxu1 %vm907_vm0, %v3201_v22 }
 0x1a2   : > { %2427 = vmatmul.mubr.msk.f32.vlgmr.msra.gmra.mrb[0].mxu1 %vm907_vm0, %v3204_v25 }
 0x1bd   : > { %v2391_v20 = vpop.f32.mrb[2].mxu0 }
 0x1be   : > { %v1038_v21 = vadd.f32 %v2391_v20, %v3196_v14  ;;  %v1032_v7 = vpop.f32.mrb[3].mxu0 }
 0x1bf   : > { %v1033_v2 = vadd.f32 %v3196_v14, %v1032_v7 }
 0x1c0   : > { %2620 = vtanh.f32 %v1038_v21  ;;  %v1453_v21 = vsub.s32 7, %v2936_v37 }
 0x1c1   : > { %2622 = vtanh.f32 %v1033_v2  ;;  %v2394_v32 = vpop.f32.mrb[4].mxu0 }
 0x1c2   : > { %v1048_v35 = vadd.f32 %v2394_v32, %v3196_v14  ;;  %v1042_v39 = vpop.f32.mrb[5].mxu0 }
 0x1c3   : > { %v1043_v43 = vadd.f32 %v3196_v14, %v1042_v39 }
 0x1c4   : > { %2624 = vtanh.f32 %v1048_v35  ;;  %v1384_v1 = vpop.permute.xlu1 %1383  ;;  %v1380_v50 = vpop.permute.xlu0 %1379 }
 0x1c5   : > { %2626 = vtanh.f32 %v1043_v43  ;;  %vm1463_vm1 = vcmp.ne.f32.partialorder %v1384_v1, 0.0  ;;  %vm1462_vm3 = vcmp.ne.f32.partialorder %v1380_v50, 0.0 }
 0x1ca   : > { %v2621_v52 = vpop.eup %2620 }
 0x1cb   : > { %v2623_v53 = vpop.eup %2622  ;;  %v3227_v56 = vadd.f32 %v2621_v52, %v3047_v31 }
 0x1cc   : > { %v3224_v54 = vadd.f32 %v2623_v53, %v3044_v26 }
 0x1ce   : > { %v2625_v57 = vpop.eup %2624  ;;  %2429 = vmatprep.mubr.msk.f32.mxu1 %vm907_vm0, %v3224_v54 }
 0x1cf   : > { %v2627_v48 = vpop.eup %2626  ;;  %2430 = vmatmul.mubr.msk.f32.gmra.mrb[2].mxu1 %vm907_vm0, %v3227_v56  ;;  %v3237_v59 = vadd.f32 %v2625_v57, %v3060_v34 }
 0x1d0   : > { %v3234_v58 = vadd.f32 %v2627_v48, %v3053_v30 }
 0x1d2   : > { %2432 = vmatprep.mubr.msk.f32.mxu1 %vm907_vm0, %v3234_v58 }
 0x1d3   : > { %2433 = vmatmul.mubr.msk.f32.gmra.mrb[4].mxu1 %vm907_vm0, %v3237_v59 }
 0x1d4   : > { %v2397_v26 = vpop.f32.mrb[6].mxu0 }
 0x1d5   : > { %v1058_v31 = vadd.f32 %v2397_v26, %v3196_v14  ;;  %v1052_v28 = vpop.f32.mrb[7].mxu0 }
 0x1d6   : > { %v1053_v38 = vadd.f32 %v3196_v14, %v1052_v28 }
 0x1d7   : > { %2628 = vtanh.f32 %v1058_v31 }
 0x1d8   : > { %2630 = vtanh.f32 %v1053_v38 }
 0x1e1   : > { %v2629_v63 = vpop.eup %2628 }
 0x1e2   : > { %v2631_v30 = vpop.eup %2630  ;;  %v3249_v34 = vadd.f32 %v2629_v63, %v3075_v0 }
 0x1e3   : > { %v3246_v3 = vadd.f32 %v2631_v30, %v3073_v62  ;;  %v1431_v62 = vsub.s32 5, %v2936_v37 }
 0x1e5   : > { %2435 = vmatprep.mubr.msk.f32.mxu1 %vm907_vm0, %v3246_v3  ;;  %v1432_v36 = vrot.slane %v3189_v51, %v1431_v62 }
 0x1e6   : > { %2436 = vmatmul.mubr.msk.f32.gmra.mrb[6].mxu1 %vm907_vm0, %v3249_v34 }
 0x1e7   : > { %1438 = vbcast.lane.b32.xlu1 %v1432_v36, 264  ;;  %1434 = vbcast.lane.b32.xlu0 %v1432_v36, 256 }
 0x1f4   : > { %v2400_v4 = vpop.f32.mrb[8].mxu0 }
 0x1f5   : > { %v1068_v5 = vadd.f32 %v2400_v4, %v3196_v14  ;;  %v1062_v60 = vpop.f32.mrb[9].mxu0 }
 0x1f6   : > { %v1063_v8 = vadd.f32 %v3196_v14, %v1062_v60 }
 0x1f7   : > { %2632 = vtanh.f32 %v1068_v5 }
 0x1f8   : > { %2634 = vtanh.f32 %v1063_v8 }
 0x201   : > { %v2633_v0 = vpop.eup %2632 }
 0x202   : > { %v2635_v46 = vpop.eup %2634  ;;  %v3263_v10 = vadd.f32 %v2633_v0, %v3126_v61 }
 0x203   : > { %v3260_v47 = vadd.f32 %v2635_v46, %v3094_v24  ;;  %v1442_v24 = vsub.s32 6, %v2936_v37 }
 0x205   : > { %2438 = vmatprep.mubr.msk.f32.mxu1 %vm907_vm0, %v3260_v47  ;;  %v1443_v15 = vrot.slane %v3189_v51, %v1442_v24 }
 0x206   : > { %2439 = vmatmul.mubr.msk.f32.gmra.mrb[8].mxu1 %vm907_vm0, %v3263_v10 }
 0x207   : > { %1449 = vbcast.lane.b32.xlu1 %v1443_v15, 264  ;;  %1445 = vbcast.lane.b32.xlu0 %v1443_v15, 256  ;;  %v1395_v15 = vpop.permute.xlu1 %1394 }
 0x208   : > { %vm1465_vm4 = vcmp.ne.f32.partialorder %v1395_v15, 0.0 }
 0x20c   : > { %v2403_v11 = vpop.f32.mrb[10].mxu0 }
 0x20d   : > { %v1078_v12 = vadd.f32 %v2403_v11, %v3196_v14  ;;  %v1072_v55 = vpop.f32.mrb[11].mxu0 }
 0x20e   : > { %v1073_v33 = vadd.f32 %v3196_v14, %v1072_v55 }
 0x20f   : > { %2636 = vtanh.f32 %v1078_v12 }
 0x210   : > { %2638 = vtanh.f32 %v1073_v33 }
 0x219   : > { %v2637_v61 = vpop.eup %2636 }
 0x21a   : > { %v2639_v16 = vpop.eup %2638  ;;  %v3277_v17 = vadd.f32 %v2637_v61, %v3146_v19 }
 0x21b   : > { %v3274_v42 = vadd.f32 %v2639_v16, %v3140_v9  ;;  %v1454_v9 = vrot.slane %v3189_v51, %v1453_v21  ;;  %v1391_v16 = vpop.permute.xlu0 %1390 }
 0x21c   : > { %vm1464_vm5 = vcmp.ne.f32.partialorder %v1391_v16, 0.0 }
 0x21d   : > { %2441 = vmatprep.mubr.msk.f32.mxu1 %vm907_vm0, %v3274_v42  ;;  %1460 = vbcast.lane.b32.xlu1 %v1454_v9, 264 }
 0x21e   : > { %2442 = vmatmul.mubr.msk.f32.gmra.mrb[10].mxu1 %vm907_vm0, %v3277_v17  ;;  %1456 = vbcast.lane.b32.xlu0 %v1454_v9, 256  ;;  %v1406_v9 = vpop.permute.xlu1 %1405 }
 0x21f   : > { %vm1467_vm6 = vcmp.ne.f32.partialorder %v1406_v9, 0.0 }
 0x220   : > { %v2406_v18 = vpop.f32.mrb[12].mxu0 }
 0x221   : > { %v1088_v29 = vadd.f32 %v2406_v18, %v3196_v14  ;;  %v1082_v27 = vpop.f32.mrb[13].mxu0 }
 0x222   : > { %v1083_v20 = vadd.f32 %v3196_v14, %v1082_v27 }
 0x223   : > { %2640 = vtanh.f32 %v1088_v29 }
 0x224   : > { %2642 = vtanh.f32 %v1083_v20 }
 0x22d   : > { %v2641_v19 = vpop.eup %2640 }
 0x22e   : > { %v2643_v7 = vpop.eup %2642  ;;  %v3291_v32 = vadd.f32 %v2641_v19, %v3162_v6 }
 0x22f   : > { %v3288_v2 = vadd.f32 %v2643_v7, %v3160_v23  ;;  %v1402_v7 = vpop.permute.xlu0 %1401 }
 0x230   : > { %vm1466_vm7 = vcmp.ne.f32.partialorder %v1402_v7, 0.0 }
 0x231   : > { %2444 = vmatprep.mubr.msk.f32.mxu1 %vm907_vm0, %v3288_v2 }
 0x232   : > { %v2409_v35 = vpop.f32.mrb[14].mxu0  ;;  %2445 = vmatmul.mubr.msk.f32.gmra.mrb[12].mxu1 %vm907_vm0, %v3291_v32 }
 0x233   : > { %v1098_v37 = vadd.f32 %v2409_v35, %v3196_v14  ;;  %v1092_v51 = vpop.f32.mrb[15].mxu0 }
 0x234   : > { %v1093_v39 = vadd.f32 %v3196_v14, %v1092_v51  ;;  %v3312_v14 = vld [vmem:[%s3558_s7] ss:$0 sm:$0xff] }
 0x235   : > { %2644 = vtanh.f32 %v1098_v37 }
 0x236   : > { %2646 = vtanh.f32 %v1093_v39 }
 0x23f   : > { %v2645_v43 = vpop.eup %2644 }
 0x240   : > { %v2647_v23 = vpop.eup %2646  ;;  %v3303_v6 = vadd.f32 %v2645_v43, %v3175_v49 }
 0x241   : > { %v3300_v44 = vadd.f32 %v2647_v23, %v3171_v13 }
 0x243   : > { %2447 = vmatprep.mubr.msk.f32.mxu1 %vm907_vm0, %v3300_v44 }
 0x244   : > { %2448 = vmatmul.mubr.msk.f32.gmra.mrb[14].mxu1 %vm907_vm0, %v3303_v6 }
 0x275   : > { %v2428_v52 = vpop.f32.mrb[0].mxu1 }
 0x276   : > { %v3315_v13 = vadd.f32 %v2428_v52, %v3312_v14  ;;  %v1262_v49 = vpop.f32.mrb[1].mxu1 }
 0x277   : > { %v3318_v53 = vadd.f32 %v3312_v14, %v1262_v49 }
 0x278   : > { %v1511_v57 = vsel %vm1463_vm1, %v3315_v13, -1e+30 }
 0x279   : > { %v1528_v48 = vsel %vm1526_vm2, %v1511_v57, -inf  ;;  %v1510_v26 = vsel %vm1462_vm3, %v3318_v53, -1e+30  ;;  %vm1823_vm3 = vcmask 261120  }
 0x27a   : > { %v1527_v31 = vsel %vm1526_vm2, %v1510_v26, -inf }
 0x27b   : > { %v1529_v28 = vmax.f32 %v1527_v31, %v1528_v48 }
 0x27d   : > { %v1530_v38 = vrot.slane %v1529_v28, 4 }
 0x27f   : > { %v1531_v63 = vmax.f32 %v1529_v28, %v1530_v38 }
 0x281   : > { %v1532_v30 = vrot.slane %v1531_v63, 2 }
 0x283   : > { %v1533_v4 = vmax.f32 %v1531_v63, %v1532_v30 }
 0x285   : > { %v1534_v5 = vrot.slane %v1533_v4, 1 }
 0x287   : > { %v1535_v60 = vmax.f32 %v1533_v4, %v1534_v5 }
 0x289   : > { %v1599_v8 = vsub.f32 %v1510_v26, %v1535_v60  ;;  %v1600_v62 = vsub.f32 %v1511_v57, %v1535_v60 }
 0x28b   : > { %v1615_v36 = vmul.f32 1.442695, %v1599_v8  ;;  %v1617_v0 = vmul.f32 1.442695, %v1600_v62 }
 0x28d   : > { %2648 = vpow2.f32 %v1615_v36 }
 0x28e   : > { %2650 = vpow2.f32 %v1617_v0 }
 0x297   : > { %v2649_v46 = vpop.eup %2648 }
 0x298   : > { %v2651_v11 = vpop.eup %2650  ;;  %v1647_v12 = vsel %vm1526_vm2, %v2649_v46, 0.0 }
 0x299   : > { %v1648_v55 = vsel %vm1526_vm2, %v2651_v11, 0.0 }
 0x29a   : > { %v1649_v33 = vadd.f32 %v1648_v55, %v1647_v12 }
 0x29c   : > { %v1650_v24 = vrot.slane %v1649_v33, 4 }
 0x29e   : > { %v1651_v61 = vadd.f32 %v1650_v24, %v1649_v33 }
 0x2a0   : > { %v1652_v18 = vrot.slane %v1651_v61, 2 }
 0x2a2   : > { %v1653_v29 = vadd.f32 %v1652_v18, %v1651_v61  ;;  %v2431_v27 = vpop.f32.mrb[2].mxu1  ;;  %v1417_v18 = vpop.permute.xlu1 %1416 }
 0x2a3   : > { %v3327_v20 = vadd.f32 %v2431_v27, %v3312_v14  ;;  %v1272_v21 = vpop.f32.mrb[3].mxu1  ;;  %vm1469_vm8 = vcmp.ne.f32.partialorder %v1417_v18, 0.0 }
 0x2a4   : > { %v3330_v19 = vadd.f32 %v3312_v14, %v1272_v21  ;;  %v1654_v35 = vrot.slane %v1653_v29, 1 }
 0x2a5   : > { %v1513_v37 = vsel %vm1465_vm4, %v3327_v20, -1e+30  ;;  %vm1921_vm4 = vcmask 1041409  }
 0x2a6   : > { %v1537_v51 = vsel %vm1526_vm2, %v1513_v37, -inf  ;;  %v1512_v39 = vsel %vm1464_vm5, %v3330_v19, -1e+30  ;;  %v2434_v43 = vpop.f32.mrb[4].mxu1  ;;  %v1655_v23 = vadd.f32 %v1654_v35, %v1653_v29  ;;  %v1413_v29 = vpop.permute.xlu0 %1412  ;;  %vm1923_vm5 = vcmask 1042434  }
 0x2a7   : > { %v1536_v1 = vsel %vm1526_vm2, %v1512_v39, -inf  ;;  %v3337_v50 = vadd.f32 %v2434_v43, %v3312_v14  ;;  %v1282_v52 = vpop.f32.mrb[5].mxu1  ;;  %vm1468_vm9 = vcmp.ne.f32.partialorder %v1413_v29, 0.0 }
 0x2a8   : > { %v1538_v49 = vmax.f32 %v1536_v1, %v1537_v51  ;;  %v3340_v57 = vadd.f32 %v3312_v14, %v1282_v52  ;;  %2652 = vrcp.f32 %v1655_v23 }
 0x2a9   : > { %v1515_v48 = vsel %vm1467_vm6, %v3337_v50, -1e+30  ;;  %vm1925_vm6 = vcmask 1043459  }
 0x2aa   : > { %v1539_v26 = vrot.slane %v1538_v49, 4  ;;  %v1546_v31 = vsel %vm1526_vm2, %v1515_v48, -inf  ;;  %v1514_v28 = vsel %vm1466_vm7, %v3340_v57, -1e+30  ;;  %vm1927_vm7 = vcmask 1044484  }
 0x2ab   : > { %v1545_v38 = vsel %vm1526_vm2, %v1514_v28, -inf }
 0x2ac   : > { %v1540_v63 = vmax.f32 %v1538_v49, %v1539_v26  ;;  %v1547_v30 = vmax.f32 %v1545_v38, %v1546_v31 }
 0x2ae   : > { %v1541_v4 = vrot.slane %v1540_v63, 2  ;;  %v1548_v5 = vrot.slane %v1547_v30, 4 }
 0x2b0   : > { %v1542_v60 = vmax.f32 %v1540_v63, %v1541_v4  ;;  %v1549_v8 = vmax.f32 %v1547_v30, %v1548_v5 }
 0x2b2   : > { %v2653_v62 = vpop.eup %2652  ;;  %v1543_v36 = vrot.slane %v1542_v60, 1  ;;  %v1550_v0 = vrot.slane %v1549_v8, 2 }
 0x2b3   : > { %v1721_v12 = vmul.f32 %v2653_v62, %v2651_v11  ;;  %v1720_v55 = vmul.f32 %v2653_v62, %v2649_v46 }
 0x2b4   : > { %v1544_v33 = vmax.f32 %v1542_v60, %v1543_v36  ;;  %v1551_v24 = vmax.f32 %v1549_v8, %v1550_v0 }
 0x2b5   : > { %1761 = vrot.lane.b32.xlu1 %v1721_v12, %s2746_s21  ;;  %1759 = vrot.lane.b32.xlu0 %v1720_v55, %s2746_s21 }
 0x2b6   : > { %v1601_v15 = vsub.f32 %v1512_v39, %v1544_v33  ;;  %v1602_v61 = vsub.f32 %v1513_v37, %v1544_v33  ;;  %v1552_v16 = vrot.slane %v1551_v24, 1 }
 0x2b8   : > { %v1619_v27 = vmul.f32 1.442695, %v1601_v15  ;;  %v1621_v21 = vmul.f32 1.442695, %v1602_v61  ;;  %v1553_v9 = vmax.f32 %v1551_v24, %v1552_v16 }
 0x2b9   : > { %v2437_v7 = vpop.f32.mrb[6].mxu1 }
 0x2ba   : > { %2654 = vpow2.f32 %v1619_v27  ;;  %v1603_v46 = vsub.f32 %v1514_v28, %v1553_v9  ;;  %v1604_v11 = vsub.f32 %v1515_v48, %v1553_v9  ;;  %v3349_v35 = vadd.f32 %v2437_v7, %v3312_v14  ;;  %v1292_v51 = vpop.f32.mrb[7].mxu1 }
 0x2bb   : > { %2656 = vpow2.f32 %v1621_v21  ;;  %v3352_v39 = vadd.f32 %v3312_v14, %v1292_v51 }
 0x2bc   : > { %v1623_v37 = vmul.f32 1.442695, %v1603_v46  ;;  %v1625_v43 = vmul.f32 1.442695, %v1604_v11  ;;  %v1517_v23 = vsel %vm1469_vm8, %v3349_v35, -1e+30 }
 0x2bd   : > { %v1555_v1 = vsel %vm1526_vm2, %v1517_v23, -inf  ;;  %v1516_v52 = vsel %vm1468_vm9, %v3352_v39, -1e+30  ;;  %vm1929_vm8 = vcmask 1045509   ;;  %vm1931_vm9 = vcmask 1046534  }
 0x2be   : > { %2658 = vpow2.f32 %v1623_v37  ;;  %v1554_v49 = vsel %vm1526_vm2, %v1516_v52, -inf }
 0x2bf   : > { %2660 = vpow2.f32 %v1625_v43  ;;  %v1556_v48 = vmax.f32 %v1554_v49, %v1555_v1  ;;  %v1428_v1 = vpop.permute.xlu1 %1427  ;;  %v1424_v49 = vpop.permute.xlu0 %1423 }
 0x2c0   : > { %vm1471_vm10 = vcmp.ne.f32.partialorder %v1428_v1, 0.0  ;;  %vm1470_vm11 = vcmp.ne.f32.partialorder %v1424_v49, 0.0 }
 0x2c1   : > { %v1557_v26 = vrot.slane %v1556_v48, 4 }
 0x2c3   : > { %v1558_v31 = vmax.f32 %v1556_v48, %v1557_v26 }
 0x2c4   : > { %v2655_v28 = vpop.eup %2654 }
 0x2c5   : > { %v2657_v38 = vpop.eup %2656  ;;  %v1656_v63 = vsel %vm1526_vm2, %v2655_v28, 0.0  ;;  %v1559_v30 = vrot.slane %v1558_v31, 2 }
 0x2c6   : > { %v1657_v4 = vsel %vm1526_vm2, %v2657_v38, 0.0 }
 0x2c7   : > { %v1658_v5 = vadd.f32 %v1657_v4, %v1656_v63  ;;  %v1560_v60 = vmax.f32 %v1558_v31, %v1559_v30 }
 0x2c8   : > { %v2659_v8 = vpop.eup %2658 }
 0x2c9   : > { %v2661_v62 = vpop.eup %2660  ;;  %v1659_v36 = vrot.slane %v1658_v5, 4  ;;  %v1665_v0 = vsel %vm1526_vm2, %v2659_v8, 0.0  ;;  %v1561_v12 = vrot.slane %v1560_v60, 1 }
 0x2ca   : > { %v1666_v55 = vsel %vm1526_vm2, %v2661_v62, 0.0 }
 0x2cb   : > { %v1660_v33 = vadd.f32 %v1659_v36, %v1658_v5  ;;  %v1667_v24 = vadd.f32 %v1666_v55, %v1665_v0  ;;  %v1562_v15 = vmax.f32 %v1560_v60, %v1561_v12 }
 0x2cd   : > { %v1661_v61 = vrot.slane %v1660_v33, 2  ;;  %v1668_v16 = vrot.slane %v1667_v24, 4  ;;  %v1605_v18 = vsub.f32 %v1516_v52, %v1562_v15  ;;  %v1606_v29 = vsub.f32 %v1517_v23, %v1562_v15 }
 0x2cf   : > { %v1662_v27 = vadd.f32 %v1661_v61, %v1660_v33  ;;  %v1669_v21 = vadd.f32 %v1668_v16, %v1667_v24  ;;  %v1627_v9 = vmul.f32 1.442695, %v1605_v18  ;;  %v1629_v7 = vmul.f32 1.442695, %v1606_v29 }
 0x2d1   : > { %v1670_v46 = vrot.slane %v1669_v21, 2  ;;  %2662 = vpow2.f32 %v1627_v9  ;;  %v1663_v11 = vrot.slane %v1662_v27, 1 }
 0x2d2   : > { %2664 = vpow2.f32 %v1629_v7 }
 0x2d3   : > { %v1671_v51 = vadd.f32 %v1670_v46, %v1669_v21  ;;  %v1664_v37 = vadd.f32 %v1663_v11, %v1662_v27 }
 0x2d5   : > { %2666 = vrcp.f32 %v1664_v37  ;;  %v1672_v43 = vrot.slane %v1671_v51, 1 }
 0x2d7   : > { %v1673_v48 = vadd.f32 %v1672_v43, %v1671_v51 }
 0x2d9   : > { %v2440_v26 = vpop.f32.mrb[8].mxu1  ;;  %2668 = vrcp.f32 %v1673_v48 }
 0x2da   : > { %v3363_v23 = vadd.f32 %v2440_v26, %v3312_v14  ;;  %v1302_v52 = vpop.f32.mrb[9].mxu1  ;;  %v1439_v26 = vpop.permute.xlu1 %1438 }
 0x2db   : > { %v2663_v31 = vpop.eup %2662  ;;  %v3366_v63 = vadd.f32 %v3312_v14, %v1302_v52  ;;  %vm1473_vm12 = vcmp.ne.f32.partialorder %v1439_v26, 0.0 }
 0x2dc   : > { %v2665_v30 = vpop.eup %2664  ;;  %v1674_v4 = vsel %vm1526_vm2, %v2663_v31, 0.0  ;;  %v1519_v5 = vsel %vm1471_vm10, %v3363_v23, -1e+30  ;;  %vm1933_vm10 = vcmask 1047559  }
 0x2dd   : > { %v1675_v60 = vsel %vm1526_vm2, %v2665_v30, 0.0  ;;  %v1564_v36 = vsel %vm1526_vm2, %v1519_v5, -inf  ;;  %v1518_v0 = vsel %vm1470_vm11, %v3366_v63, -1e+30  ;;  %vm2187_vm11 = vcmask 7168  }
 0x2de   : > { %v1676_v12 = vadd.f32 %v1675_v60, %v1674_v4  ;;  %v1563_v55 = vsel %vm1526_vm2, %v1518_v0, -inf  ;;  %v1435_v60 = vpop.permute.xlu0 %1434 }
 0x2df   : > { %v2667_v33 = vpop.eup %2666  ;;  %v1565_v24 = vmax.f32 %v1563_v55, %v1564_v36  ;;  %vm1472_vm13 = vcmp.ne.f32.partialorder %v1435_v60, 0.0 }
 0x2e0   : > { %v1677_v15 = vrot.slane %v1676_v12, 4  ;;  %v1724_v61 = vmul.f32 %v2667_v33, %v2657_v38  ;;  %v1723_v16 = vmul.f32 %v2667_v33, %v2655_v28 }
 0x2e1   : > { %v1566_v18 = vrot.slane %v1565_v24, 4 }
 0x2e2   : > { %v1678_v29 = vadd.f32 %v1677_v15, %v1676_v12  ;;  %1765 = vrot.lane.b32.xlu1 %v1724_v61, %s2746_s21  ;;  %1763 = vrot.lane.b32.xlu0 %v1723_v16, %s2746_s21 }
 0x2e3   : > { %v2669_v27 = vpop.eup %2668  ;;  %v1567_v21 = vmax.f32 %v1565_v24, %v1566_v18 }
 0x2e4   : > { %v1679_v9 = vrot.slane %v1678_v29, 2  ;;  %v1727_v7 = vmul.f32 %v2669_v27, %v2661_v62  ;;  %v1726_v46 = vmul.f32 %v2669_v27, %v2659_v8 }
 0x2e5   : > { %v1568_v11 = vrot.slane %v1567_v21, 2 }
 0x2e6   : > { %v1680_v51 = vadd.f32 %v1679_v9, %v1678_v29  ;;  %1769 = vrot.lane.b32.xlu1 %v1727_v7, %s2746_s21  ;;  %1767 = vrot.lane.b32.xlu0 %v1726_v46, %s2746_s21 }
 0x2e7   : > { %v1569_v37 = vmax.f32 %v1567_v21, %v1568_v11 }
 0x2e8   : > { %v1681_v38 = vrot.slane %v1680_v51, 1 }
 0x2e9   : > { %v1570_v28 = vrot.slane %v1569_v37, 1 }
 0x2ea   : > { %v1682_v43 = vadd.f32 %v1681_v38, %v1680_v51 }
 0x2eb   : > { %v1571_v1 = vmax.f32 %v1569_v37, %v1570_v28 }
 0x2ec   : > { %2670 = vrcp.f32 %v1682_v43  ;;  %v1446_v43 = vpop.permute.xlu0 %1445 }
 0x2ed   : > { %v1607_v49 = vsub.f32 %v1518_v0, %v1571_v1  ;;  %v1608_v48 = vsub.f32 %v1519_v5, %v1571_v1  ;;  %vm1474_vm15 = vcmp.ne.f32.partialorder %v1446_v43, 0.0 }
 0x2ef   : > { %v1631_v52 = vmul.f32 1.442695, %v1607_v49  ;;  %v1633_v4 = vmul.f32 1.442695, %v1608_v48 }
 0x2f0   : > { %v1457_v43 = vpop.permute.xlu0 %1456 }
 0x2f1   : > { %2672 = vpow2.f32 %v1631_v52  ;;  %v2443_v8 = vpop.f32.mrb[10].mxu1  ;;  %vm1476_vm1 = vcmp.ne.f32.partialorder %v1457_v43, 0.0 }
 0x2f2   : > { %2674 = vpow2.f32 %v1633_v4  ;;  %v3379_v62 = vadd.f32 %v2443_v8, %v3312_v14  ;;  %v1312_v36 = vpop.f32.mrb[11].mxu1 }
 0x2f3   : > { %v3382_v12 = vadd.f32 %v3312_v14, %v1312_v36 }
 0x2f4   : > { %v1521_v55 = vsel %vm1473_vm12, %v3379_v62, -1e+30 }
 0x2f5   : > { %v1573_v5 = vsel %vm1526_vm2, %v1521_v55, -inf  ;;  %v1520_v0 = vsel %vm1472_vm13, %v3382_v12, -1e+30 }
 0x2f6   : > { %v2671_v33 = vpop.eup %2670  ;;  %v1572_v24 = vsel %vm1526_vm2, %v1520_v0, -inf }
 0x2f7   : > { %v1574_v15 = vmax.f32 %v1572_v24, %v1573_v5  ;;  %v1730_v61 = vmul.f32 %v2671_v33, %v2665_v30  ;;  %v1729_v16 = vmul.f32 %v2671_v33, %v2663_v31  ;;  %v1450_v30 = vpop.permute.xlu1 %1449 }
 0x2f8   : > { %vm1475_vm14 = vcmp.ne.f32.partialorder %v1450_v30, 0.0 }
 0x2f9   : > { %v1575_v18 = vrot.slane %v1574_v15, 4  ;;  %1773 = vrot.lane.b32.xlu1 %v1730_v61, %s2746_s21  ;;  %1771 = vrot.lane.b32.xlu0 %v1729_v16, %s2746_s21 }
 0x2fb   : > { %v2673_v29 = vpop.eup %2672  ;;  %v1576_v27 = vmax.f32 %v1574_v15, %v1575_v18 }
 0x2fc   : > { %v2675_v21 = vpop.eup %2674  ;;  %v1683_v9 = vsel %vm1526_vm2, %v2673_v29, 0.0 }
 0x2fd   : > { %v1684_v7 = vsel %vm1526_vm2, %v2675_v21, 0.0  ;;  %v1577_v46 = vrot.slane %v1576_v27, 2 }
 0x2fe   : > { %v1685_v11 = vadd.f32 %v1684_v7, %v1683_v9 }
 0x2ff   : > { %v1578_v51 = vmax.f32 %v1576_v27, %v1577_v46 }
 0x300   : > { %v1686_v37 = vrot.slane %v1685_v11, 4 }
 0x301   : > { %v1579_v38 = vrot.slane %v1578_v51, 1 }
 0x302   : > { %v1687_v28 = vadd.f32 %v1686_v37, %v1685_v11  ;;  %v1461_v37 = vpop.permute.xlu1 %1460 }
 0x303   : > { %v1580_v31 = vmax.f32 %v1578_v51, %v1579_v38  ;;  %vm1477_vm0 = vcmp.ne.f32.partialorder %v1461_v37, 0.0 }
 0x304   : > { %v1688_v1 = vrot.slane %v1687_v28, 2 }
 0x305   : > { %v1609_v49 = vsub.f32 %v1520_v0, %v1580_v31  ;;  %v1610_v48 = vsub.f32 %v1521_v55, %v1580_v31  ;;  %v2446_v26 = vpop.f32.mrb[12].mxu1 }
 0x306   : > { %v1689_v52 = vadd.f32 %v1688_v1, %v1687_v28  ;;  %v3393_v4 = vadd.f32 %v2446_v26, %v3312_v14  ;;  %v1322_v60 = vpop.f32.mrb[13].mxu1 }
 0x307   : > { %v1635_v8 = vmul.f32 1.442695, %v1609_v49  ;;  %v1637_v36 = vmul.f32 1.442695, %v1610_v48  ;;  %v3396_v5 = vadd.f32 %v3312_v14, %v1322_v60 }
 0x308   : > { %v1523_v33 = vsel %vm1475_vm14, %v3393_v4, -1e+30  ;;  %v1690_v24 = vrot.slane %v1689_v52, 1 }
 0x309   : > { %2676 = vpow2.f32 %v1635_v8  ;;  %v1582_v0 = vsel %vm1526_vm2, %v1523_v33, -inf  ;;  %v1522_v55 = vsel %vm1474_vm15, %v3396_v5, -1e+30 }
 0x30a   : > { %2678 = vpow2.f32 %v1637_v36  ;;  %v1581_v15 = vsel %vm1526_vm2, %v1522_v55, -inf  ;;  %v1691_v61 = vadd.f32 %v1690_v24, %v1689_v52 }
 0x30b   : > { %v1583_v16 = vmax.f32 %v1581_v15, %v1582_v0 }
 0x30c   : > { %2680 = vrcp.f32 %v1691_v61 }
 0x30d   : > { %v1584_v18 = vrot.slane %v1583_v16, 4  ;;  %2682 = vtanh.f32 %v3315_v13 }
 0x30e   : > { %2684 = vtanh.f32 %v3318_v53 }
 0x30f   : > { %v1585_v27 = vmax.f32 %v1583_v16, %v1584_v18 }
 0x311   : > { %v1586_v9 = vrot.slane %v1585_v27, 2 }
 0x313   : > { %v3402_v7 = vpop.eup %2676  ;;  %v1587_v46 = vmax.f32 %v1585_v27, %v1586_v9 }
 0x314   : > { %v3404_v11 = vpop.eup %2678  ;;  %v1692_v51 = vsel %vm1526_vm2, %v3402_v7, 0.0 }
 0x315   : > { %v1693_v38 = vsel %vm1526_vm2, %v3404_v11, 0.0  ;;  %v1588_v28 = vrot.slane %v1587_v46, 1 }
 0x316   : > { %v2681_v30 = vpop.eup %2680  ;;  %v1694_v31 = vadd.f32 %v1693_v38, %v1692_v51 }
 0x317   : > { %v1589_v1 = vmax.f32 %v1587_v46, %v1588_v28  ;;  %v2449_v49 = vpop.f32.mrb[14].mxu1  ;;  %v1733_v48 = vmul.f32 %v2681_v30, %v2675_v21  ;;  %v1732_v26 = vmul.f32 %v2681_v30, %v2673_v29  ;;  %v2683_v18 = vpop.eup %2682 }
 0x318   : > { %v1695_v52 = vrot.slane %v1694_v31, 4  ;;  %v3413_v60 = vadd.f32 %v2449_v49, %v3312_v14  ;;  %v1332_v8 = vpop.f32.mrb[15].mxu1  ;;  %v2685_v46 = vpop.eup %2684 }
 0x319   : > { %v1611_v36 = vsub.f32 %v1522_v55, %v1589_v1  ;;  %v1612_v24 = vsub.f32 %v1523_v33, %v1589_v1  ;;  %v3416_v0 = vadd.f32 %v3312_v14, %v1332_v8  ;;  %1777 = vrot.lane.b32.xlu1 %v1733_v48, %s2746_s21  ;;  %1775 = vrot.lane.b32.xlu0 %v1732_v26, %s2746_s21 }
 0x31a   : > { %v1696_v13 = vadd.f32 %v1695_v52, %v1694_v31  ;;  %v1525_v29 = vsel %vm1477_vm0, %v3413_v60, -1e+30  ;;  %v1357_v30 = vadd.f32 %v2685_v46, %v3201_v22  ;;  %v1358_v31 = vadd.f32 %v2683_v18, %v3204_v25 }
 0x31b   : > { %v1639_v21 = vmul.f32 1.442695, %v1611_v36  ;;  %v1641_v53 = vmul.f32 1.442695, %v1612_v24  ;;  %v1591_v15 = vsel %vm1526_vm2, %v1525_v29, -inf }
 0x31c   : > { %v1697_v61 = vrot.slane %v1696_v13, 2  ;;  %v1524_v16 = vsel %vm1476_vm1, %v3416_v0, -1e+30 }
 0x31d   : > { %2686 = vpow2.f32 %v1639_v21  ;;  %v1590_v33 = vsel %vm1526_vm2, %v1524_v16, -inf }
 0x31e   : > { %v1698_v14 = vadd.f32 %v1697_v61, %v1696_v13  ;;  %2688 = vpow2.f32 %v1641_v53  ;;  %v1592_v55 = vmax.f32 %v1590_v33, %v1591_v15 }
 0x320   : > { %v1593_v27 = vrot.slane %v1592_v55, 4  ;;  %v1699_v9 = vrot.slane %v1698_v14, 1 }
 0x322   : > { %v1594_v51 = vmax.f32 %v1592_v55, %v1593_v27  ;;  %v1700_v37 = vadd.f32 %v1699_v9, %v1698_v14 }
 0x324   : > { %v1595_v38 = vrot.slane %v1594_v51, 2  ;;  %2690 = vrcp.f32 %v1700_v37 }
 0x326   : > { %v1596_v28 = vmax.f32 %v1594_v51, %v1595_v38 }
 0x327   : > { %v2687_v43 = vpop.eup %2686  ;;  %v1760_v1 = vpop.permute.xlu0 %1759 }
 0x328   : > { %v1762_v49 = vpop.permute.xlu1 %1761  ;;  %v2689_v48 = vpop.eup %2688  ;;  %v1701_v26 = vsel %vm1526_vm2, %v2687_v43, 0.0  ;;  %v1597_v52 = vrot.slane %v1596_v28, 1  ;;  %v1807_v8 = vmul.f32 %v1760_v1, %v1357_v30 }
 0x329   : > { %v1808_v36 = vmul.f32 %v1762_v49, %v1358_v31  ;;  %v1702_v24 = vsel %vm1526_vm2, %v2689_v48, 0.0 }
 0x32a   : > { %v1703_v13 = vadd.f32 %v1702_v24, %v1701_v26  ;;  %v1598_v21 = vmax.f32 %v1596_v28, %v1597_v52  ;;  %v1824_v53 = vsel %vm1823_vm3, %v1807_v8, 0.0 }
 0x32b   : > { %v1825_v22 = vsel %vm1823_vm3, %v1808_v36, 0.0 }
 0x32c   : > { %v1826_v15 = vadd.f32 %v1825_v22, %v1824_v53  ;;  %v1704_v25 = vrot.slane %v1703_v13, 4  ;;  %v1613_v61 = vsub.f32 %v1524_v16, %v1598_v21  ;;  %v1614_v33 = vsub.f32 %v1525_v29, %v1598_v21  ;;  %v1897_v21 = vld [vmem:[%s3559_s8 + $0x8] sm:$0xff] }
 0x32e   : > { %v2691_v14 = vpop.eup %2690  ;;  %v1705_v55 = vadd.f32 %v1704_v25, %v1703_v13  ;;  %v1643_v18 = vmul.f32 1.442695, %v1613_v61  ;;  %v1645_v27 = vmul.f32 1.442695, %v1614_v33  ;;  %v1896_v13 = vld [vmem:[%s3559_s8] sm:$0xff]  ;;  %v1827_v22 = vrot.slane %v1826_v15, 4 }
 0x32f   : > { %v1736_v9 = vmul.f32 %v2691_v14, %v3404_v11  ;;  %v1735_v46 = vmul.f32 %v2691_v14, %v3402_v7 }
 0x330   : > { %v1706_v51 = vrot.slane %v1705_v55, 2  ;;  %2692 = vpow2.f32 %v1643_v18 }
 0x331   : > { %2694 = vpow2.f32 %v1645_v27  ;;  %1781 = vrot.lane.b32.xlu1 %v1736_v9, %s2746_s21  ;;  %1779 = vrot.lane.b32.xlu0 %v1735_v46, %s2746_s21 }
 0x332   : > { %v1707_v37 = vadd.f32 %v1706_v51, %v1705_v55  ;;  %v1828_v55 = vadd.f32 %v1827_v22, %v1826_v15 }
 0x334   : > { %v1708_v38 = vrot.slane %v1707_v37, 1  ;;  %v1829_v15 = vrot.slane %v1828_v55, 2 }
 0x336   : > { %v1709_v28 = vadd.f32 %v1708_v38, %v1707_v37 }
 0x338   : > { %2696 = vrcp.f32 %v1709_v28 }
 0x339   : > { %2698 = vtanh.f32 %v3327_v20  ;;  %v2516_v20 = vpack.c.bf16 %v1897_v21, %v1896_v13  ;;  %v1901_v13 = vld [vmem:[%s3559_s8 + $0x28] sm:$0xff] }
 0x33a   : > { %v2693_v29 = vpop.eup %2692  ;;  %2700 = vtanh.f32 %v3330_v19 }
 0x33b   : > { %v2695_v16 = vpop.eup %2694  ;;  %v1710_v30 = vsel %vm1526_vm2, %v2693_v29, 0.0  ;;  %2702 = vtanh.f32 %v3337_v50 }
 0x33c   : > { %v1711_v31 = vsel %vm1526_vm2, %v2695_v16, 0.0  ;;  %2704 = vtanh.f32 %v3340_v57  ;;  %vm2748_vm2 = vmmov 0  }
 0x33d   : > { %v1712_v11 = vadd.f32 %v1711_v31, %v1710_v30 }
 0x33f   : > { %v1713_v1 = vrot.slane %v1712_v11, 4 }
 0x341   : > { %v1714_v7 = vadd.f32 %v1713_v1, %v1712_v11 }
 0x342   : > { %v2697_v49 = vpop.eup %2696 }
 0x343   : > { %v1715_v26 = vrot.slane %v1714_v7, 2  ;;  %v1739_v52 = vmul.f32 %v2697_v49, %v2689_v48  ;;  %v1738_v8 = vmul.f32 %v2697_v49, %v2687_v43  ;;  %v2747_v48 = vmov 0.0|0.0   ;;  %v2699_v19 = vpop.eup %2698 }
 0x344   : > { %2515 = vmatprep.subr.bf16.mxu0 %v2747_v48  ;;  %2521 = vmatprep.subr.bf16.mxu1 %v2747_v48  ;;  %v2701_v53 = vpop.eup %2700  ;;  %v1360_v33 = vadd.f32 %v2699_v19, %v3227_v56  ;;  %v1899_v56 = vld [vmem:[%s3559_s8 + $0x18] sm:$0xff] }
 0x345   : > { %v1716_v36 = vadd.f32 %v1715_v26, %v1714_v7  ;;  %1785 = vrot.lane.b32.xlu1 %v1739_v52, %s2746_s21  ;;  %1783 = vrot.lane.b32.xlu0 %v1738_v8, %s2746_s21  ;;  %v2703_v25 = vpop.eup %2702  ;;  %v1359_v61 = vadd.f32 %v2701_v53, %v3224_v54  ;;  %v1898_v54 = vld [vmem:[%s3559_s8 + $0x10] sm:$0xff]  ;;  %v2749_v26 = vmov 0.0   ;;  %v1830_v52 = vadd.f32 %v1829_v15, %v1828_v55 }
 0x346   : > { %2517 = vmatpush3.bf16.msra.mxu0 %v2516_v20  ;;  %v2705_v14 = vpop.eup %2704  ;;  %v1362_v30 = vadd.f32 %v2703_v25, %v3237_v59  ;;  %v2519_v11 = vpack.c.bf16 %v1899_v56, %v1898_v54  ;;  %2458 = vmatprep.mubr.msk.f32.mxu0 %vm2748_vm2, %v2749_v26 }
 0x347   : > { %v1717_v24 = vrot.slane %v1716_v36, 1  ;;  %2518 = vmatprep.subr.bf16.mxu0 %v2747_v48  ;;  %v1361_v28 = vadd.f32 %v2705_v14, %v3234_v58  ;;  %2469 = vmatprep.mubr.msk.f32.mxu1 %vm2748_vm2, %v2749_v26  ;;  %v1831_v19 = vrot.slane %v1830_v52, 1 }
 0x349   : > { %v1718_v43 = vadd.f32 %v1717_v24, %v1716_v36  ;;  %v1900_v24 = vld [vmem:[%s3559_s8 + $0x20] sm:$0xff] }
 0x34a   : > { %2520 = vmatpush3.bf16.msra.mxu0 %v2519_v11 }
 0x34b   : > { %2706 = vrcp.f32 %v1718_v43  ;;  %2527 = vmatprep.subr.bf16.mxu0 %v2747_v48  ;;  %v2522_v43 = vpack.c.bf16 %v1901_v13, %v1900_v24 }
 0x34c   : > { %2708 = vtanh.f32 %v3349_v35 }
 0x34d   : > { %2710 = vtanh.f32 %v3352_v39  ;;  %2523 = vmatpush3.bf16.msra.mxu1 %v2522_v43  ;;  %v1832_v39 = vadd.f32 %v1831_v19, %v1830_v52 }
 0x34e   : > { %2524 = vmatprep.subr.bf16.mxu1 %v2747_v48  ;;  %2712 = vtanh.f32 %v3363_v23 }
 0x34f   : > { %2714 = vtanh.f32 %v3366_v63 }
 0x350   : > { %2716 = vtanh.f32 %v3379_v62 }
 0x351   : > { %2718 = vtanh.f32 %v3382_v12 }
 0x352   : > { %2720 = vtanh.f32 %v3393_v4 }
 0x353   : > { %2722 = vtanh.f32 %v3396_v5 }
 0x354   : > { %v1764_v18 = vpop.permute.xlu0 %1763  ;;  %v1766_v27 = vpop.permute.xlu1 %1765  ;;  %2724 = vtanh.f32 %v3413_v60 }
 0x355   : > { %v2707_v50 = vpop.eup %2706  ;;  %v1809_v9 = vmul.f32 %v1764_v18, %v1359_v61  ;;  %v1810_v46 = vmul.f32 %v1766_v27, %v1360_v33  ;;  %2726 = vtanh.f32 %v3416_v0 }
 0x356   : > { %v1742_v57 = vmul.f32 %v2707_v50, %v2695_v16  ;;  %v1741_v51 = vmul.f32 %v2707_v50, %v2693_v29  ;;  %v2709_v14 = vpop.eup %2708 }
 0x357   : > { %v1833_v37 = vsel %vm1823_vm3, %v1809_v9, 0.0  ;;  %v1834_v38 = vsel %vm1823_vm3, %v1810_v46, 0.0  ;;  %v2711_v27 = vpop.eup %2710 }
 0x358   : > { %v1835_v31 = vadd.f32 %v1834_v38, %v1833_v37  ;;  %1789 = vrot.lane.b32.xlu1 %v1742_v57, %s2746_s21  ;;  %1787 = vrot.lane.b32.xlu0 %v1741_v51, %s2746_s21  ;;  %v1768_v29 = vpop.permute.xlu0 %1767  ;;  %v1770_v16 = vpop.permute.xlu1 %1769  ;;  %v1363_v46 = vadd.f32 %v2711_v27, %v3246_v3  ;;  %v1364_v57 = vadd.f32 %v2709_v14, %v3249_v34 }
 0x359   : > { %v1811_v58 = vmul.f32 %v1768_v29, %v1361_v28  ;;  %v1812_v1 = vmul.f32 %v1770_v16, %v1362_v30  ;;  %v2713_v34 = vpop.eup %2712 }
 0x35a   : > { %v1836_v59 = vrot.slane %v1835_v31, 4 }
 0x35b   : > { %v1842_v7 = vsel %vm1823_vm3, %v1811_v58, 0.0  ;;  %v1843_v49 = vsel %vm1823_vm3, %v1812_v1, 0.0  ;;  %v2715_v1 = vpop.eup %2714 }
 0x35c   : > { %v1837_v8 = vadd.f32 %v1836_v59, %v1835_v31  ;;  %v1844_v36 = vadd.f32 %v1843_v49, %v1842_v7  ;;  %v1365_v59 = vadd.f32 %v2715_v1, %v3260_v47  ;;  %v1366_v7 = vadd.f32 %v2713_v34, %v3263_v10 }
 0x35e   : > { %v1838_v21 = vrot.slane %v1837_v8, 2  ;;  %v1845_v20 = vrot.slane %v1844_v36, 4 }
 0x360   : > { %v1839_v35 = vadd.f32 %v1838_v21, %v1837_v8  ;;  %v1846_v53 = vadd.f32 %v1845_v20, %v1844_v36 }
 0x362   : > { %v1840_v22 = vrot.slane %v1839_v35, 1  ;;  %v1847_v25 = vrot.slane %v1846_v53, 2 }
 0x364   : > { %v1841_v61 = vadd.f32 %v1840_v22, %v1839_v35  ;;  %v1848_v33 = vadd.f32 %v1847_v25, %v1846_v53  ;;  %v2717_v35 = vpop.eup %2716 }
 0x365   : > { %v2719_v53 = vpop.eup %2718  ;;  %v1368_v25 = vadd.f32 %v2717_v35, %v3277_v17 }
 0x366   : > { %v1922_v55 = vsel %vm1921_vm4, %v1841_v61, %v1832_v39  ;;  %v1849_v18 = vrot.slane %v1848_v33, 1  ;;  %v1367_v22 = vadd.f32 %v2719_v53, %v3274_v42 }
 0x368   : > { %v1850_v50 = vadd.f32 %v1849_v18, %v1848_v33 }
 0x36a   : > { %v1924_v9 = vsel %vm1923_vm5, %v1850_v50, %v1922_v55 }
 0x36b   : > { %v1772_v51 = vpop.permute.xlu0 %1771  ;;  %v1774_v37 = vpop.permute.xlu1 %1773 }
 0x36c   : > { %v1813_v38 = vmul.f32 %v1772_v51, %v1363_v46  ;;  %v1814_v28 = vmul.f32 %v1774_v37, %v1364_v57  ;;  %v2721_v46 = vpop.eup %2720 }
 0x36d   : > { %v2723_v17 = vpop.eup %2722 }
 0x36e   : > { %v1851_v30 = vsel %vm1823_vm3, %v1813_v38, 0.0  ;;  %v1852_v54 = vsel %vm1823_vm3, %v1814_v28, 0.0  ;;  %v1369_v37 = vadd.f32 %v2723_v17, %v3288_v2  ;;  %v1370_v38 = vadd.f32 %v2721_v46, %v3291_v32  ;;  %v2725_v2 = vpop.eup %2724 }
 0x36f   : > { %v1853_v56 = vadd.f32 %v1852_v54, %v1851_v30  ;;  %v2727_v32 = vpop.eup %2726  ;;  %v1372_v1 = vadd.f32 %v2725_v2, %v3303_v6  ;;  %v1902_v6 = vld [vmem:[%s3559_s8 + $0x30] sm:$0xff] }
 0x370   : > { %v1371_v34 = vadd.f32 %v2727_v32, %v3300_v44 }
 0x371   : > { %v1854_v15 = vrot.slane %v1853_v56, 4 }
 0x373   : > { %v1855_v31 = vadd.f32 %v1854_v15, %v1853_v56 }
 0x375   : > { %v1856_v29 = vrot.slane %v1855_v31, 2 }
 0x377   : > { %v1857_v16 = vadd.f32 %v1856_v29, %v1855_v31 }
 0x379   : > { %v1858_v11 = vrot.slane %v1857_v16, 1 }
 0x37b   : > { %v1859_v58 = vadd.f32 %v1858_v11, %v1857_v16 }
 0x37d   : > { %v1926_v3 = vsel %vm1925_vm6, %v1859_v58, %v1924_v9 }
 0x38b   : > { %v1776_v49 = vpop.permute.xlu0 %1775  ;;  %v1778_v52 = vpop.permute.xlu1 %1777 }
 0x38c   : > { %v1815_v8 = vmul.f32 %v1776_v49, %v1365_v59  ;;  %v1816_v36 = vmul.f32 %v1778_v52, %v1366_v7 }
 0x38e   : > { %v1860_v24 = vsel %vm1823_vm3, %v1815_v8, 0.0  ;;  %v1861_v13 = vsel %vm1823_vm3, %v1816_v36, 0.0 }
 0x38f   : > { %v1862_v21 = vadd.f32 %v1861_v13, %v1860_v24 }
 0x391   : > { %v1863_v20 = vrot.slane %v1862_v21, 4 }
 0x393   : > { %v1864_v23 = vadd.f32 %v1863_v20, %v1862_v21 }
 0x395   : > { %v1865_v63 = vrot.slane %v1864_v23, 2 }
 0x397   : > { %v1866_v43 = vadd.f32 %v1865_v63, %v1864_v23 }
 0x399   : > { %v1867_v47 = vrot.slane %v1866_v43, 1 }
 0x39b   : > { %v1868_v10 = vadd.f32 %v1867_v47, %v1866_v43  ;;  %v1903_v43 = vld [vmem:[%s3559_s8 + $0x38] sm:$0xff] }
 0x39c   : > { %v2525_v47 = vpack.c.bf16 %v1903_v43, %v1902_v6 }
 0x39d   : > { %v1928_v19 = vsel %vm1927_vm7, %v1868_v10, %v1926_v3  ;;  %v1908_v10 = vld [vmem:[%s3560_s9] sm:$0x7] }
 0x39e   : > { %2526 = vmatpush3.bf16.msra.mxu1 %v2525_v47 }
 0x3a3   : > { %v1780_v39 = vpop.permute.xlu0 %1779  ;;  %v1782_v61 = vpop.permute.xlu1 %1781 }
 0x3a4   : > { %v1817_v33 = vmul.f32 %v1780_v39, %v1367_v22  ;;  %v1818_v14 = vmul.f32 %v1782_v61, %v1368_v25  ;;  %v1904_v39 = vld [vmem:[%s3559_s8 + $0x40] sm:$0xff]  ;;  %v1905_v61 = vld [vmem:[%s3559_s8 + $0x48] sm:$0xff] }
 0x3a6   : > { %v1869_v62 = vsel %vm1823_vm3, %v1817_v33, 0.0  ;;  %v1870_v12 = vsel %vm1823_vm3, %v1818_v14, 0.0  ;;  %v2528_v33 = vpack.c.bf16 %v1905_v61, %v1904_v39  ;;  %v1907_v14 = vld [vmem:[%s3559_s8 + $0x58] sm:$0xff] }
 0x3a7   : > { %v1871_v55 = vadd.f32 %v1870_v12, %v1869_v62  ;;  %v2013_v12 = vrot.slane %v1908_v10, %v2946_v41  ;;  %v2302_v41 = vld [vmem:[%s3561_s10] ss:$0 sm:$0xff] }
 0x3a9   : > { %v1872_v18 = vrot.slane %v1871_v55, 4 }
 0x3ab   : > { %v1873_v27 = vadd.f32 %v1872_v18, %v1871_v55 }
 0x3ad   : > { %v1874_v50 = vrot.slane %v1873_v27, 2 }
 0x3af   : > { %v1875_v9 = vadd.f32 %v1874_v50, %v1873_v27 }
 0x3b1   : > { %v1876_v42 = vrot.slane %v1875_v9, 1 }
 0x3b3   : > { %v1877_v57 = vadd.f32 %v1876_v42, %v1875_v9  ;;  %v2092_v42 = vrot.slane %v1908_v10, %v2954_v45 }
 0x3b5   : > { %v1930_v51 = vsel %vm1929_vm8, %v1877_v57, %v1928_v19  ;;  %v1912_v19 = vrot.slane %v1908_v10, %v2943_v40  ;;  %v1906_v40 = vld [vmem:[%s3559_s8 + $0x50] sm:$0xff] }
 0x3b6   : > { %v2531_v62 = vpack.c.bf16 %v1907_v14, %v1906_v40 }
 0x3b7   : > { %v1784_v28 = vpop.permute.xlu0 %1783  ;;  %v1786_v30 = vpop.permute.xlu1 %1785 }
 0x3b8   : > { %v1819_v54 = vmul.f32 %v1784_v28, %v1369_v37  ;;  %v1820_v4 = vmul.f32 %v1786_v30, %v1370_v38  ;;  %v2303_v28 = vld [vmem:[#allocation2] ss:$0 sm:$0xff] }
 0x3ba   : > { %v1878_v5 = vsel %vm1823_vm3, %v1819_v54, 0.0  ;;  %v1879_v56 = vsel %vm1823_vm3, %v1820_v4, 0.0 }
 0x3bb   : > { %v1880_v15 = vadd.f32 %v1879_v56, %v1878_v5 }
 0x3bd   : > { %v1881_v31 = vrot.slane %v1880_v15, 4 }
 0x3bf   : > { %v1882_v29 = vadd.f32 %v1881_v31, %v1880_v15 }
 0x3c1   : > { %v1883_v16 = vrot.slane %v1882_v29, 2 }
 0x3c3   : > { %v1884_v11 = vadd.f32 %v1883_v16, %v1882_v29 }
 0x3c5   : > { %v1885_v58 = vrot.slane %v1884_v11, 1 }
 0x3c7   : > { %v1886_v3 = vadd.f32 %v1885_v58, %v1884_v11 }
 0x3c9   : > { %v1932_v59 = vsel %vm1931_vm9, %v1886_v3, %v1930_v51 }
 0x3ca   : > { %v1788_v7 = vpop.permute.xlu0 %1787  ;;  %v1790_v49 = vpop.permute.xlu1 %1789 }
 0x3cb   : > { %v1821_v60 = vmul.f32 %v1788_v7, %v1371_v34  ;;  %v1822_v52 = vmul.f32 %v1790_v49, %v1372_v1 }
 0x3cd   : > { %v1887_v0 = vsel %vm1823_vm3, %v1821_v60, 0.0  ;;  %v1888_v8 = vsel %vm1823_vm3, %v1822_v52, 0.0 }
 0x3ce   : > { %v1889_v36 = vadd.f32 %v1888_v8, %v1887_v0 }
 0x3d0   : > { %v1890_v24 = vrot.slane %v1889_v36, 4 }
 0x3d2   : > { %v1891_v13 = vadd.f32 %v1890_v24, %v1889_v36 }
 0x3d4   : > { %v1892_v21 = vrot.slane %v1891_v13, 2 }
 0x3d6   : > { %v1893_v20 = vadd.f32 %v1892_v21, %v1891_v13 }
 0x3d8   : > { %v1894_v23 = vrot.slane %v1893_v20, 1 }
 0x3da   : > { %v1895_v63 = vadd.f32 %v1894_v23, %v1893_v20 }
 0x3dc   : > { %v1934_v44 = vsel %vm1933_vm10, %v1895_v63, %v1932_v59 }
 0x3dd   : > { %2459 = vmatmul.mubr.msk.f32.vlgmr.msra.gmra.mrb[16].mxu0 %vm1823_vm3, %v1934_v44 }
 0x3de   : > { %2480 = vmatprep.mubr.msk.f32.mxu0 %vm2748_vm2, %v2749_v26  ;;  %2529 = vmatpush3.bf16.msra.mxu0 %v2528_v33 }
 0x3df   : > { %2530 = vmatprep.subr.bf16.mxu0 %v2747_v48 }
 0x3e2   : > { %2532 = vmatpush3.bf16.msra.mxu0 %v2531_v62 }
 0x4b0   : > { %v2003_v35 = vpop.f32.mrb[16].mxu0 }
 0x4b1   : > { %v2004_v53 = vadd.f32 %v2003_v35, %v1912_v19  ;;  %v2460_v22 = vpop.f32.mrb[17].mxu0 }
 0x4b3   : > { %2728 = vtanh.f32 %v2004_v53 }
 0x4bd   : > { %v2729_v26 = vpop.eup %2728 }
 0x4be   : > { %v2009_v25 = vadd.f32 %v2729_v26, %v1934_v44 }
 0x4c0   : > { %2470 = vmatmul.mubr.msk.f32.vlgmr.msra.gmra.mrb[16].mxu1 %vm1823_vm3, %v2009_v25 }
 0x593   : > { %v2083_v55 = vpop.f32.mrb[16].mxu1 }
 0x594   : > { %v2084_v18 = vadd.f32 %v2083_v55, %v2013_v12  ;;  %v2471_v27 = vpop.f32.mrb[17].mxu1 }
 0x596   : > { %2730 = vtanh.f32 %v2084_v18 }
 0x5a0   : > { %v2731_v50 = vpop.eup %2730 }
 0x5a1   : > { %v2088_v9 = vadd.f32 %v2731_v50, %v2009_v25 }
 0x5a3   : > { %2481 = vmatmul.mubr.msk.f32.vlgmr.msra.gmra.mrb[18].mxu0 %vm1823_vm3, %v2088_v9 }
 0x676   : > { %v2162_v46 = vpop.f32.mrb[18].mxu0 }
 0x677   : > { %v2163_v17 = vadd.f32 %v2162_v46, %v2092_v42  ;;  %v2482_v57 = vpop.f32.mrb[19].mxu0 }
 0x679   : > { %2732 = vtanh.f32 %v2163_v17 }
 0x683   : > { %v2733_v51 = vpop.eup %2732 }
 0x684   : > { %v2167_v48 = vadd.f32 %v2733_v51, %v2088_v9 }
 0x686   : > { %v2175_v37 = vmul.f32 %v2302_v41, %v2167_v48 }
 0x688   : > { %v2176_v38 = vsel %vm1823_vm3, %v2175_v37, 0.0 }
 0x689   : > { %2177 = vadd.xlane.f32.xlu0 %v2176_v38 }
 0x716   : > { %v2178_v45 = vpop.xlane.xlu0 %2177 }
 0x717   : > { %v2186_v30 = vadd.f32 %v2303_v28, %v2178_v45 }
 0x719   : > { %2188 = vst.msk [vmem:[%s435_s20] sm:$0xff] %vm2187_vm11, %v2186_v30 }
 0x71a PF: > { %s24_s23 = sadd.s32 1, %s2740_s23  }
 0x71b   : > { %p21_p5 = scmp.ge.s32.totalorder %s24_s23, 4  }
 0x71d   :  { %23 = sbr.rel (!%p21_p5) target bundleno = 3 (0x3), region = 101 }

</bundles_post_ra>
